<compile_context>
chip_gen: v7x
topology: tpu7x:2x2x1
jax: 0.10.0
libtpu: 0.0.40
codegen_flags: <defaults>
</compile_context>

<pallas_src>
import functools

import jax
import jax.numpy as jnp
from jax.experimental import pallas as pl
from jax.experimental.pallas import tpu as pltpu


SUBLANE = 8
_TILE_CANDIDATES = (512, 1024, 1536, 2048)      # >=512 keeps tiles near HBM roofline
VMEM_LIMIT_BYTES = 48 * 1024 * 1024             # > scoped defaults, < v7x physical 64 MiB


def _round_up(x, m):
    return ((x + m - 1) // m) * m


def _pick_tile(dim, candidates=_TILE_CANDIDATES):
    """Tile minimizing padded size (ties -> larger tile)."""
    best_t, best_pad = None, None
    for t in candidates:
        pad = _round_up(dim, t)
        if best_pad is None or pad < best_pad or (pad == best_pad and t > best_t):
            best_t, best_pad = t, pad
    return best_t, best_pad


# ---------------------------------------------------------------------------
# Kernels
# ---------------------------------------------------------------------------
def _linear_kernel_multik(x_ref, w_ref, b_ref, o_ref, acc_ref, *, apply_relu, tk):
    """grid = (N_tiles, K_tiles); x row is VMEM-resident, K reduced into f32 scratch."""
    k = pl.program_id(1)

    @pl.when(k == 0)
    def _init():
        acc_ref[...] = jnp.zeros_like(acc_ref)

    kk = pl.multiple_of(k * tk, tk)
    acc_ref[...] += jnp.dot(
        x_ref[:, pl.ds(kk, tk)], w_ref[...], preferred_element_type=jnp.float32
    )

    @pl.when(k == pl.num_programs(1) - 1)
    def _finalize():
        y = acc_ref[...] + b_ref[...]          # (1, tn) bias broadcasts over rows
        if apply_relu:
            y = jnp.maximum(y, 0.0)
        o_ref[...] = y.astype(o_ref.dtype)


def _linear_kernel_1k(x_ref, w_ref, b_ref, o_ref, *, apply_relu):
    """Single reduction step: no accumulator scratch needed."""
    y = jnp.dot(x_ref[...], w_ref[...], preferred_element_type=jnp.float32) + b_ref[...]
    if apply_relu:
        y = jnp.maximum(y, 0.0)
    o_ref[...] = y.astype(o_ref.dtype)


def _bottleneck_kernel(x_ref, w1_ref, b1_ref, w2_ref, b2_ref, enc_ref, h_ref):
    """Fused (h3 -> latent, ReLU) then (latent -> h3, ReLU); weights fully resident."""
    z = jnp.dot(x_ref[...], w1_ref[...], preferred_element_type=jnp.float32) + b1_ref[...]
    z = jnp.maximum(z, 0.0)
    z_bf = z.astype(enc_ref.dtype)
    enc_ref[...] = z_bf
    h = jnp.dot(z_bf, w2_ref[...], preferred_element_type=jnp.float32) + b2_ref[...]
    h = jnp.maximum(h, 0.0)
    h_ref[...] = h.astype(h_ref.dtype)


# ---------------------------------------------------------------------------
# Layer wrappers
# ---------------------------------------------------------------------------
def linear_pallas(x_pad, layer, *, apply_relu, out_dtype=jnp.bfloat16):
    """y_pad = relu?(x_pad @ W_pad + b_pad); padded bf16 in, padded out (out_dtype)."""
    w_t, b2 = layer["w_t"], layer["b2"]        # (K_pad, N_pad) bf16, (1, N_pad) f32
    tk, tn = layer["tk"], layer["tn"]
    K_pad, N_pad = w_t.shape
    M_pad = x_pad.shape[0]
    assert x_pad.shape[1] == K_pad
    n_n, n_k = N_pad // tn, K_pad // tk

    if n_k == 1:
        kernel = functools.partial(_linear_kernel_1k, apply_relu=apply_relu)
        grid = (n_n,)
        in_specs = [
            pl.BlockSpec((M_pad, K_pad), lambda j: (0, 0)),    # resident activation row
            pl.BlockSpec((K_pad, tn), lambda j: (0, j)),       # bf16 weight tile
            pl.BlockSpec((1, tn), lambda j: (0, j)),           # f32 bias tile
        ]
        out_specs = pl.BlockSpec((M_pad, tn), lambda j: (0, j))
        scratch = []
        dim_sem = ("parallel",)
    else:
        kernel = functools.partial(_linear_kernel_multik, apply_relu=apply_relu, tk=tk)
        grid = (n_n, n_k)                                      # parallel N leads (v7x megacore)
        in_specs = [
            pl.BlockSpec((M_pad, K_pad), lambda j, k: (0, 0)),
            pl.BlockSpec((tk, tn), lambda j, k: (k, j)),
            pl.BlockSpec((1, tn), lambda j, k: (0, j)),
        ]
        out_specs = pl.BlockSpec((M_pad, tn), lambda j, k: (0, j))
        scratch = [pltpu.VMEM((M_pad, tn), jnp.float32)]
        dim_sem = ("parallel", "arbitrary")

    return pl.pallas_call(
        kernel,
        out_shape=jax.ShapeDtypeStruct((M_pad, N_pad), out_dtype),
        grid_spec=pltpu.PrefetchScalarGridSpec(
            num_scalar_prefetch=0,
            grid=grid,
            in_specs=in_specs,
            out_specs=out_specs,
            scratch_shapes=scratch,
        ),
        compiler_params=pltpu.CompilerParams(
            dimension_semantics=dim_sem,
            vmem_limit_bytes=VMEM_LIMIT_BYTES,
        ),
    )(x_pad, w_t, b2)


def bottleneck_pallas(x_pad, enc_layer, dec_layer):
    """Fused encoder[-1] + decoder[0]; returns (encoded_pad bf16, h_pad bf16)."""
    w1, b1 = enc_layer["w_t"], enc_layer["b2"]
    w2, b2 = dec_layer["w_t"], dec_layer["b2"]
    K_pad, L_pad = w1.shape
    L_pad2, H_pad = w2.shape
    assert L_pad == L_pad2
    M_pad = x_pad.shape[0]
    assert x_pad.shape[1] == K_pad

    return pl.pallas_call(
        _bottleneck_kernel,
        out_shape=(
            jax.ShapeDtypeStruct((M_pad, L_pad), jnp.bfloat16),
            jax.ShapeDtypeStruct((M_pad, H_pad), jnp.bfloat16),
        ),
        grid_spec=pltpu.PrefetchScalarGridSpec(
            num_scalar_prefetch=0,
            grid=(1,),
            in_specs=[
                pl.BlockSpec((M_pad, K_pad), lambda i: (0, 0)),
                pl.BlockSpec((K_pad, L_pad), lambda i: (0, 0)),
                pl.BlockSpec((1, L_pad), lambda i: (0, 0)),
                pl.BlockSpec((L_pad, H_pad), lambda i: (0, 0)),
                pl.BlockSpec((1, H_pad), lambda i: (0, 0)),
            ],
            out_specs=(
                pl.BlockSpec((M_pad, L_pad), lambda i: (0, 0)),
                pl.BlockSpec((M_pad, H_pad), lambda i: (0, 0)),
            ),
        ),
        compiler_params=pltpu.CompilerParams(
            dimension_semantics=("arbitrary",),
            vmem_limit_bytes=VMEM_LIMIT_BYTES,
        ),
    )(x_pad, w1, b1, w2, b2)


# ---------------------------------------------------------------------------
# Parameters + forward
# ---------------------------------------------------------------------------
def _make_linear_layer(key, fan_in, fan_out, weight_dtype=jnp.bfloat16):
    """nn.Linear-style init, stored transposed (in, out), zero-padded to the tile grid."""
    tk, k_pad = _pick_tile(fan_in)
    tn, n_pad = _pick_tile(fan_out)

    kw, kb = jax.random.split(key)
    bound = 1.0 / (fan_in ** 0.5)              # PyTorch nn.Linear default init range
    # TODO(synk): for the real 21600x10800 layer, generate/cast the weight in column
    # chunks to avoid the ~1 GB f32 temporary at init (numerics are unaffected).
    w_t = jax.random.uniform(kw, (fan_in, fan_out), jnp.float32, -bound, bound)
    b = jax.random.uniform(kb, (fan_out,), jnp.float32, -bound, bound)

    w_t_pad = (
        jnp.zeros((k_pad, n_pad), weight_dtype)
        .at[:fan_in, :fan_out]
        .set(w_t.astype(weight_dtype))
    )
    # Bias pad MUST stay zero so padded activation columns remain exactly zero.
    b2 = jnp.zeros((1, n_pad), jnp.float32).at[0, :fan_out].set(b)

    return dict(w_t=w_t_pad, b2=b2, fan_in=fan_in, fan_out=fan_out,
                tk=tk, tn=tn, k_pad=k_pad, n_pad=n_pad)


def init_autoencoder_params(key, input_size, h1, h2, h3, latent_dim):
    """Encoder: input->h1->h2->h3->latent (ReLU each). Decoder: mirror, last plain."""
    enc_dims = [(input_size, h1), (h1, h2), (h2, h3), (h3, latent_dim)]
    dec_dims = [(latent_dim, h3), (h3, h2), (h2, h1), (h1, input_size)]
    params = {"encoder": [], "decoder": []}
    for name, dims in (("encoder", enc_dims), ("decoder", dec_dims)):
        for fan_in, fan_out in dims:
            key, sub = jax.random.split(key)
            params[name].append(_make_linear_layer(sub, fan_in, fan_out))
    # Chained layers share one padded width per logical dim (activations chain unsliced).
    chain = params["encoder"] + params["decoder"]
    for a, b in zip(chain[:-1], chain[1:]):
        assert a["n_pad"] == b["k_pad"], (a["n_pad"], b["k_pad"])
    return params


def autoencoder_forward(params, x):
    """Returns (encoded, decoded) matching the PyTorch forward (bf16 weights/acts)."""
    enc_layers, dec_layers = params["encoder"], params["decoder"]
    M, K = x.shape
    M_pad = _round_up(max(M, SUBLANE), SUBLANE)
    K_pad = enc_layers[0]["k_pad"]

    # Pad + cast once; all inter-layer activations stay padded bf16.
    h = jnp.zeros((M_pad, K_pad), jnp.bfloat16).at[:M, :K].set(x.astype(jnp.bfloat16))

    for layer in enc_layers[:-1]:
        h = linear_pallas(h, layer, apply_relu=True)

    # Fused latent bottleneck: encoder[-1] (+ReLU) and decoder[0] (+ReLU) in one call.
    encoded_pad, h = bottleneck_pallas(h, enc_layers[-1], dec_layers[0])

    for layer in dec_layers[1:-1]:
        h = linear_pallas(h, layer, apply_relu=True)
    h = linear_pallas(h, dec_layers[-1], apply_relu=False, out_dtype=jnp.float32)

    encoded = encoded_pad[:M, : enc_layers[-1]["fan_out"]].astype(jnp.float32)
    decoded = h[:M, : dec_layers[-1]["fan_out"]]
    return encoded, decoded


# ---------------------------------------------------------------------------
# Reference (pure JAX, same bf16-weight/activation + f32-accumulate math)
# ---------------------------------------------------------------------------
def autoencoder_ref(params, x):
    def lin(h, layer, relu, out_dtype):
        w = layer["w_t"][: layer["fan_in"], : layer["fan_out"]]
        b = layer["b2"][0, : layer["fan_out"]]
        y = jnp.dot(h, w, preferred_element_type=jnp.float32) + b
        if relu:
            y = jnp.maximum(y, 0.0)
        return y.astype(out_dtype)

    h = x.astype(jnp.bfloat16)
    for layer in params["encoder"]:
        h = lin(h, layer, True, jnp.bfloat16)
    encoded = h
    dec = params["decoder"]
    for idx, layer in enumerate(dec):
        last = idx == len(dec) - 1
        h = lin(h, layer, not last, jnp.float32 if last else jnp.bfloat16)
    return encoded.astype(jnp.float32), h


if __name__ == "__main__":
    # ~10x-smaller stand-ins for (input, 21600, 10800, 4096, 256); intentionally NOT
    # multiples of 256 so the padding path, multi-K (input dim -> 5 K-tiles of 512),
    # multi-N (final layer), single-K, and the fused bottleneck are all exercised.
    BATCH = 4
    INPUT_SIZE = 2100
    H1, H2, H3 = 640, 300, 200
    LATENT = 96

    key = jax.random.PRNGKey(0)
    key, kparam, kx = jax.random.split(key, 3)

    params = init_autoencoder_params(kparam, INPUT_SIZE, H1, H2, H3, LATENT)
    x = jax.random.normal(kx, (BATCH, INPUT_SIZE), jnp.float32)

    encoded, decoded = autoencoder_forward(params, x)
    jax.block_until_ready((encoded, decoded))

    enc_ref, dec_ref = autoencoder_ref(params, x)
    assert encoded.shape == (BATCH, LATENT), encoded.shape
    assert decoded.shape == (BATCH, INPUT_SIZE), decoded.shape
    assert bool(jnp.allclose(encoded, enc_ref, atol=1e-2, rtol=1e-2))
    assert bool(jnp.allclose(decoded, dec_ref, atol=1e-2, rtol=1e-2))

    print("KERNEL_OK")
</pallas_src>

<mosaic_0001>
module attributes {stable_mosaic.version = 11 : i64} {
  func.func @_linear_kernel_multik(%arg0: i32, %arg1: i32, %arg2: memref<8x2560xbf16, #tpu.memory_space<vmem>>, %arg3: memref<512x1024xbf16, #tpu.memory_space<vmem>>, %arg4: memref<1x1024xf32, #tpu.memory_space<vmem>>, %arg5: memref<8x1024xbf16, #tpu.memory_space<vmem>>, %arg6: memref<8x1024xf32, #tpu.memory_space<vmem>>) attributes {dimension_semantics = [#tpu.dimension_semantics<parallel>, #tpu.dimension_semantics<arbitrary>], iteration_bounds = array<i64: 1, 5>, scalar_prefetch = 0 : i64, scratch_operands = 1 : i64, tpu.core_type = #tpu.core_type<tc>, window_params = [{pipeline_mode = #tpu.pipeline_mode<synchronous>, transform_indices = @transform_0, window_bounds = array<i64: 8, 2560>}, {transform_indices = @transform_1, window_bounds = array<i64: 512, 1024>}, {transform_indices = @transform_2, window_bounds = array<i64: 1, 1024>}, {transform_indices = @transform_3, window_bounds = array<i64: 8, 1024>}]} {
    %c0_i32 = arith.constant 0 : i32
    %0 = arith.cmpi eq, %arg1, %c0_i32 : i32
    %1 = arith.extui %0 : i1 to i32
    %c0_i32_0 = arith.constant 0 : i32
    %2 = arith.cmpi ne, %1, %c0_i32_0 : i32
    scf.if %2 {
      %cst_8 = arith.constant 0.000000e+00 : f32
      %15 = vector.broadcast %cst_8 : f32 to vector<8x1024xf32>
      %c0_9 = arith.constant 0 : index
      %c0_10 = arith.constant 0 : index
      %16 = vector.load %arg6[%c0_9, %c0_10] : memref<8x1024xf32, #tpu.memory_space<vmem>>, vector<8x1024xf32>
      tpu.vector_store %arg6[%c0_9, %c0_10], %15 {strides = array<i32>} : memref<8x1024xf32, #tpu.memory_space<vmem>>, vector<8x1024xf32>,
    } else {
    }
    %c512_i32 = arith.constant 512 : i32
    %3 = arith.muli %arg1, %c512_i32 : i32
    %4 = tpu.assume_multiple %3, 512 : i32
    %c0 = arith.constant 0 : index
    %c0_1 = arith.constant 0 : index
    %5 = vector.load %arg6[%c0, %c0_1] : memref<8x1024xf32, #tpu.memory_space<vmem>>, vector<8x1024xf32>
    %c0_2 = arith.constant 0 : index
    %6 = arith.index_cast %4 : i32 to index
    %7 = vector.load %arg2[%c0_2, %6] : memref<8x2560xbf16, #tpu.memory_space<vmem>>, vector<8x512xbf16>
    %c0_3 = arith.constant 0 : index
    %c0_4 = arith.constant 0 : index
    %8 = vector.load %arg3[%c0_3, %c0_4] : memref<512x1024xbf16, #tpu.memory_space<vmem>>, vector<512x1024xbf16>
    %cst = arith.constant dense<0.000000e+00> : vector<8x1024xf32>
    %9 = tpu.matmul %7, %8, %cst {dimension_numbers = #tpu.dot_dimension_numbers<[1], [0], [0], [1], [0, 0, 1, 1], [], []>} : vector<8x512xbf16>, vector<512x1024xbf16>, vector<8x1024xf32> -> vector<8x1024xf32>
    %10 = arith.addf %5, %9 : vector<8x1024xf32>
    %c0_5 = arith.constant 0 : index
    %c0_6 = arith.constant 0 : index
    %11 = vector.load %arg6[%c0_5, %c0_6] : memref<8x1024xf32, #tpu.memory_space<vmem>>, vector<8x1024xf32>
    tpu.vector_store %arg6[%c0_5, %c0_6], %10 {strides = array<i32>} : memref<8x1024xf32, #tpu.memory_space<vmem>>, vector<8x1024xf32>,
    %c4_i32 = arith.constant 4 : i32
    %12 = arith.cmpi eq, %arg1, %c4_i32 : i32
    %13 = arith.extui %12 : i1 to i32
    %c0_i32_7 = arith.constant 0 : i32
    %14 = arith.cmpi ne, %13, %c0_i32_7 : i32
    scf.if %14 {
      %c0_8 = arith.constant 0 : index
      %c0_9 = arith.constant 0 : index
      %15 = vector.load %arg6[%c0_8, %c0_9] : memref<8x1024xf32, #tpu.memory_space<vmem>>, vector<8x1024xf32>
      %c0_10 = arith.constant 0 : index
      %c0_11 = arith.constant 0 : index
      %16 = vector.load %arg4[%c0_10, %c0_11] : memref<1x1024xf32, #tpu.memory_space<vmem>>, vector<1x1024xf32>
      %17 = vector.broadcast %16 : vector<1x1024xf32> to vector<8x1024xf32>
      %18 = arith.addf %15, %17 : vector<8x1024xf32>
      %cst_12 = arith.constant 0.000000e+00 : f32
      %19 = vector.broadcast %cst_12 : f32 to vector<8x1024xf32>
      %20 = arith.maximumf %18, %19 : vector<8x1024xf32>
      %21 = arith.truncf %20 : vector<8x1024xf32> to vector<8x1024xbf16>
      %c0_13 = arith.constant 0 : index
      %c0_14 = arith.constant 0 : index
      %22 = vector.load %arg5[%c0_13, %c0_14] : memref<8x1024xbf16, #tpu.memory_space<vmem>>, vector<8x1024xbf16>
      tpu.vector_store %arg5[%c0_13, %c0_14], %21 {strides = array<i32>} : memref<8x1024xbf16, #tpu.memory_space<vmem>>, vector<8x1024xbf16>,
    } else {
    }
    return
  }
  func.func @transform_0(%arg0: i32, %arg1: i32) -> (i32, i32) {
    %c0_i32 = arith.constant 0 : i32
    %c0_i32_0 = arith.constant 0 : i32
    %c0_i32_1 = arith.constant 0 : i32
    return %c0_i32, %c0_i32_0 : i32, i32
  }
  func.func @transform_1(%arg0: i32, %arg1: i32) -> (i32, i32) {
    %c0_i32 = arith.constant 0 : i32
    return %arg1, %arg0 : i32, i32
  }
  func.func @transform_2(%arg0: i32, %arg1: i32) -> (i32, i32) {
    %c0_i32 = arith.constant 0 : i32
    %c0_i32_0 = arith.constant 0 : i32
    return %c0_i32, %arg0 : i32, i32
  }
  func.func @transform_3(%arg0: i32, %arg1: i32) -> (i32, i32) {
    %c0_i32 = arith.constant 0 : i32
    %c0_i32_0 = arith.constant 0 : i32
    return %c0_i32, %arg0 : i32, i32
  }
}

</mosaic_0001>

<bundles_post_ra>
// kernel: tpu_custom_call.1
= control target key start
LH: loop header
LB: loop body
LE: loop exit
PB: predicated region body
PF: predicated region fallthrough
CT: control target
= control target key end

     0   :  { %8 = vsyncpa [#allocation4], 0  ;;  %s3455_s0 = inlined_call_operand.hbm [shape: bf16[8,2560], index: 0, kind: input, shape index: {}]   ;;  %s3456_s1 = inlined_call_operand.hbm [shape: bf16[2560,1024], index: 1, kind: input, shape index: {}]   ;;  %s3457_s2 = inlined_call_operand.hbm [shape: f32[1,1024], index: 2, kind: input, shape index: {}]   ;;  %s3458_s3 = inlined_call_operand.hbm [shape: bf16[8,1024], index: 3, kind: output, shape index: {}]  }
   0x1   :  { %9 = vsyncpa [#allocation7], 0 }
   0x2   :  { %11 = vsyncpa [#allocation7 + $0x1], 0 }
   0x3   :  { %12 = vsyncpa [#allocation5], 0  ;;  %s2946_s12 = smov 0   ;;  %s2948_s13 = smov 0  }
   0x4   :  { %s2950_s14 = smov 0   ;;  %s2952_s15 = smov 0  }
   0x5   :  { %s2954_s16 = smov 0   ;;  %s2956_s17 = smov 0  }
   0x6 LB: > { %s2975_s18 = sadd.s32 4294967295, %s2917_s17   ;;  %s60_s19 = sadd.s32 1, %s2905_s14  ;;  %s2917_s17 = sphi %s2956_s17, %s18_s17   ;;  %s2913_s16 = sphi %s2954_s16, %s3478_s16   ;;  %s2909_s15 = sphi %s2952_s15, %s3477_s15   ;;  %s2905_s14 = sphi %s2950_s14, %s3476_s14   ;;  %s2901_s13 = sphi %s2948_s13, %s3475_s13   ;;  %s2897_s12 = sphi %s2946_s12, %s3474_s12  }
   0x7   : > { %p67_p0 = scmp.ne.s32.totalorder %s2905_s14, %s2901_s13  ;;  %p68_p1 = scmp.eq.s32.totalorder %s2917_s17, 0 }
   0x8   : > { %p73_p2 = scmp.ne.s32.totalorder %s2901_s13, %s2897_s12  ;;  %p3459_p3 = scmp.eq.s32.totalorder %s2975_s18, 0 }
   0x9   : > { %p69_p4 = por %p68_p1, %p67_p0  ;;  %p2363_p5 = scmp.ge.s32.totalorder %s2917_s17, 1 }
   0xa   : > { %p2986_p6 = por %p3459_p3, %p73_p2  ;;  %p136_p7 = scmp.lt.s32.totalorder %s2917_s17, 6 }
   0xb   : > { %s2919_s22 = smov [#allocation8]   ;;  %p2680_p10 = scmp.lt.s32.totalorder %s2917_s17, 5 }
   0xc   : > { %s3463_s20 = scalar_select %p2986_p6, 1, 0 }
   0xd   : > { %p2991_p8 = pnand %p2363_p5, %p136_p7  ;;  %s163_s23 = sshll.u32 %s2919_s22, 4  ;;  %s164_s23 = int_to_ptr.vmem [resolvable:$true] %s163_s23 }
   0xe   : > { %p3004_p12 = pnand %p2680_p10, %p69_p4  ;;  %s2920_s26 = smov [#allocation3]  }
   0xf   : > { %s3464_s21 = scalar_select %p2991_p8, 1, 0 }
  0x10   : > { %p2667_p9 = pneg %p2991_p8  ;;  %s149_s27 = sshll.u32 %s2920_s26, 4  ;;  %s150_s27 = int_to_ptr.vmem [resolvable:$true] %s149_s27 }
  0x11   : > { %s3466_s25 = scalar_select %p3004_p12, 1, 0 }
  0x12   : > { %p3000_p11 = pnand %p2667_p9, %p3459_p3  ;;  %s2743_s30 = scalar_lea.hbm %s3457_s2, 128 }
  0x13   : > { %p2744_p13 = scmp.ne.s32.totalorder %s3457_s2, %s2743_s30  ;;  %p2750_p4 = scmp.lt.u32.totalorder %s2743_s30, %s3457_s2 }
  0x14   : > { %p2745_p0 = pneg %p3000_p11 }
  0x16   : > { %p2746_p1 = pnand %p2745_p0, %p2744_p13 }
  0x18   : > { %p2747_p2 = pneg %p2746_p1 }
  0x1a   : > { %p2752_p5 = pnand %p2750_p4, %p2747_p2 }
  0x1c   : > { %2755 = shalt.err (!%p2752_p5)
}
  0x1d   : > { %s2756_s8 = scalar_lea.vmem %s164_s23, 128  ;;  %p2764_p3 = scmp.lt.s32.totalorder %s164_s23, %s164_s23 }
  0x1e   : > { %p2757_p7 = scmp.ne.s32.totalorder %s164_s23, %s2756_s8  ;;  %p2765_p6 = scmp.lt.s32.totalorder %s2756_s8, %s2756_s8 }
  0x20   : > { %p2759_p9 = pnand %p2757_p7, %p2745_p0  ;;  %p2766_p8 = por %p2765_p6, %p2764_p3 }
  0x22   : > { %p2760_p10 = pneg %p2759_p9 }
  0x24   : > { %p2767_p12 = pnand %p2766_p8, %p2760_p10 }
  0x26   : > { %2770 = shalt.err (!%p2767_p12)
}
  0x27   : > { %2673 = dma.hbm_to_vmem [thread:$0]  (!%p3000_p11), %s3457_s2, 128, %s164_s23, [#allocation7]  }
  0x28   : > { %s2771_s22 = scalar_lea.hbm %s3455_s0, 1280 }
  0x29   : > { %p2772_p13 = scmp.ne.s32.totalorder %s3455_s0, %s2771_s22  ;;  %p2778_p8 = scmp.lt.u32.totalorder %s2771_s22, %s3455_s0 }
  0x2b   : > { %p2774_p3 = pnand %p2772_p13, %p2745_p0 }
  0x2d   : > { %p2775_p6 = pneg %p2774_p3 }
  0x2f   : > { %p2780_p12 = pnand %p2778_p8, %p2775_p6 }
  0x31   : > { %2783 = shalt.err (!%p2780_p12)
}
  0x32   : > { %s2784_s23 = scalar_lea.vmem %s150_s27, 1280  ;;  %p2792_p5 = scmp.lt.s32.totalorder %s150_s27, %s150_s27 }
  0x33   : > { %p2785_p1 = scmp.ne.s32.totalorder %s150_s27, %s2784_s23  ;;  %p2793_p7 = scmp.lt.s32.totalorder %s2784_s23, %s2784_s23 }
  0x35   : > { %p2787_p2 = pnand %p2785_p1, %p2745_p0  ;;  %p2794_p9 = por %p2793_p7, %p2792_p5 }
  0x37   : > { %p2788_p4 = pneg %p2787_p2 }
  0x39   : > { %p2795_p10 = pnand %p2794_p9, %p2788_p4 }
  0x3b   : > { %2798 = shalt.err (!%p2795_p10)
}
  0x3c   : > { %2670 = dma.hbm_to_vmem [thread:$0]  (!%p3000_p11), %s3455_s0, 1280, %s150_s27, [#allocation4]  }
  0x3d   : > { %s174_s6 = sand.u32 1, %s2917_s17   ;;  %s27_s7 = sadd.s32 1, %s2913_s16 }
  0x3e   : > { %p28_p0 = scmp.ge.s32.totalorder %s27_s7, 5  ;;  %s176_s8 = sand.u32 1, %s2905_s14  }
  0x3f   : > { %s2367_s9 = sshll.u32 %s176_s8, 11  ;;  %s2648_s10 = sshll.u32 %s2913_s16, 15 }
  0x40   : > { %s3480_s7 = smov (%p28_p0, %s27_s7), 0  ;;  %s3059_s12 = scalar_lea.hbm %s3456_s1, %s2648_s10 }
  0x41   : > { %s55_s27 = ssub.s32 %s2913_s16, %s3480_s7  ;;  %s178_s22 = scalar_lea.vmem [#allocation6], %s2367_s9 }
  0x42   : > { %s188_s26 = sshll.u32 %s178_s22, 4  ;;  %p58_p11 = scmp.eq.s32.totalorder %s55_s27, 0  ;;  %s3063_s26 = int_to_ptr.vmem [resolvable:$true] %s188_s26 }
  0x43   : > { %s3070_s29 = scalar_lea.sflag [#allocation7], %s174_s6  ;;  %s2799_s30 = scalar_lea.hbm %s3059_s12, 32768 }
  0x44   : > { %s3068_s28 = scalar_select %p58_p11, %s2905_s14, %s60_s19  }
  0x45   : > { %p2800_p13 = scmp.ne.s32.totalorder %s3059_s12, %s2799_s30  ;;  %p3467_p3 = scmp.ne.s32.totalorder %s3466_s25, 0 }
  0x46   : > { %s2804_s5 = scalar_lea.hbm %s3456_s1, 163840  ;;  %p2805_p1 = scmp.lt.u32.totalorder %s3059_s12, %s3456_s1 }
  0x47   : > { %p2801_p6 = pneg %p3467_p3  ;;  %p2806_p2 = scmp.lt.u32.totalorder %s2804_s5, %s2799_s30 }
  0x48   : > { %p2808_p5 = scmp.lt.u32.totalorder %s2799_s30, %s3059_s12 }
  0x49   : > { %p2802_p8 = pnand %p2801_p6, %p2800_p13  ;;  %p2807_p4 = por %p2806_p2, %p2805_p1 }
  0x4b   : > { %p2803_p12 = pneg %p2802_p8  ;;  %p2809_p7 = por %p2808_p5, %p2807_p4 }
  0x4d   : > { %p2810_p9 = pnand %p2809_p7, %p2803_p12 }
  0x4f   : > { %2813 = shalt.err (!%p2810_p9)
}
  0x50   : > { %s2814_s19 = scalar_lea.vmem %s3063_s26, 32768  ;;  %s2921_s6 = smov [#allocation6]  }
  0x51   : > { %p2815_p10 = scmp.ne.s32.totalorder %s3063_s26, %s2814_s19  ;;  %s2819_s10 = sshll.u32 %s2921_s6, 4  ;;  %s2820_s10 = int_to_ptr.vmem [resolvable:$false] %s2819_s10 }
  0x52   : > { %s2821_s24 = scalar_lea.vmem %s2820_s10, 65536  ;;  %p2822_p13 = scmp.lt.s32.totalorder %s3063_s26, %s2820_s10 }
  0x53   : > { %p2817_p0 = pnand %p2815_p10, %p2801_p6  ;;  %p2823_p8 = scmp.lt.s32.totalorder %s2821_s24, %s2814_s19 }
  0x55   : > { %p2818_p11 = pneg %p2817_p0  ;;  %p2824_p1 = por %p2823_p8, %p2822_p13 }
  0x57   : > { %p2825_p2 = pnand %p2824_p1, %p2818_p11 }
  0x59   : > { %2828 = shalt.err (!%p2825_p2)
}
  0x5a   : > { %s2922_s11 = smov 512   ;;  %s2923_s27 = smov 32  }
  0x5b   : > { %2677 = dma.hbm_to_vmem [thread:$0]  (!%p3467_p3), %s3059_s12, 32768, %s3063_s26, %s3070_s29, %s2922_s11, %s2922_s11, %s2923_s27  }
  0x5c   : > { %p3468_p6 = scmp.ne.s32.totalorder %s3464_s21, 0 }
  0x5d   : > { %p3469_p12 = scmp.eq.s32.totalorder (!%p3468_p6), %s2975_s18, 0 }
  0x5e   : > { %200 = sbr.rel (%p3468_p6) target bundleno = 638 (0x27e), region = 32 }
  0x65   : > { %2880 = dma.done.wait (%p3469_p12), [#allocation4], 1280   ;;  %p3470_p4 = pmov %p3469_p12 }
  0x66   : > { %s206_s22 = sand.u32 1, %s2975_s18   ;;  %s208_s30 = sand.u32 1, %s2901_s13  }
  0x67   : > { %2882 = vsyncadd (%p3470_p4), [#allocation4], 4294966016  ;;  %s2373_s23 = sshll.u32 %s208_s30, 11  ;;  %s207_s4 = scalar_lea.sflag [#allocation7], %s206_s22 }
  0x68   : > { %s3106_s5 = scalar_lea.vmem [#allocation6], %s2373_s23  ;;  %p3471_p5 = scmp.ne.s32.totalorder %s3463_s20, 0 }
  0x6a   : > { %2884 = dma.done.wait (%p3471_p5), %s207_s4, 32768  }
  0x6b   : > { %2886 = vsyncadd (%p3471_p5), %s207_s4, 4294934528  ;;  %p3472_p3 = pmov %p3470_p4 }
  0x6d   : > { %2888 = dma.done.wait (%p3472_p3), [#allocation7], 128   ;;  %p3473_p7 = pmov %p3472_p3 }
  0x6e   : > { %p2375_p9 = scmp.ne.s32.totalorder %s2909_s15, 0 }
  0x6f   : > { %2890 = vsyncadd (%p3473_p7), [#allocation7], 4294967168  ;;  %v2924_v0 = vmov (!%p2375_p9), 0.0  }
  0x70   : > { %239 = sbr.rel (%p2375_p9) target bundleno = 119 (0x77), region = 48  ;;  %240 = vst [vmem:[#allocation2] sm:$0xff] (!%p2375_p9), %v2924_v0  ;;  %241 = vst [vmem:[#allocation2 + $0x8] sm:$0xff] (!%p2375_p9), %v2924_v0 }
  0x71   : > { %242 = vst [vmem:[#allocation2 + $0x10] sm:$0xff] (!%p2375_p9), %v2924_v0  ;;  %243 = vst [vmem:[#allocation2 + $0x18] sm:$0xff] (!%p2375_p9), %v2924_v0 }
  0x72   : > { %244 = vst [vmem:[#allocation2 + $0x20] sm:$0xff] (!%p2375_p9), %v2924_v0  ;;  %245 = vst [vmem:[#allocation2 + $0x28] sm:$0xff] (!%p2375_p9), %v2924_v0 }
  0x73   : > { %246 = vst [vmem:[#allocation2 + $0x30] sm:$0xff] (!%p2375_p9), %v2924_v0  ;;  %247 = vst [vmem:[#allocation2 + $0x38] sm:$0xff] (!%p2375_p9), %v2924_v0 }
  0x77 PF: > { %v263_v1 = vld [vmem:[%s3106_s5] sm:$0xff]  ;;  %s2376_s20 = sshll.u32 %s2909_s15, 9  ;;  %p2638_p10 = scmp.ne.s32.totalorder %s2909_s15, 4 }
  0x78   : > { %v267_v2 = vld [vmem:[%s3106_s5 + $0x20] sm:$0xff]  ;;  %s3138_s21 = sshra.s32 %s2376_s20, 7 }
  0x79   : > { %v391_v3 = vld [vmem:[%s3106_s5 + $0x400] sm:$0xff]  ;;  %v2383_v4 = vcombine.high %v263_v1, %v267_v2  ;;  %v2382_v6 = vcombine.low %v263_v1, %v267_v2  ;;  %s2377_s25 = sshll.u32 %s3138_s21, 2 }
  0x7a   : > { %v395_v5 = vld [vmem:[%s3106_s5 + $0x420] sm:$0xff]  ;;  %s260_s12 = scalar_lea.vmem [#allocation3], %s2377_s25 }
  0x7b   : > { %v271_v7 = vld [vmem:[%s3106_s5 + $0x40] sm:$0xff]  ;;  %v2511_v9 = vcombine.high %v391_v3, %v395_v5  ;;  %v2510_v10 = vcombine.low %v391_v3, %v395_v5  ;;  %1813 = vmatprep.subr.bf16.mxu0 %v2383_v4  ;;  %v3149_v54 = vld [vmem:[%s260_s12] sm:$0xff]  ;;  %v3151_v55 = vld [vmem:[%s260_s12 + $0x8] sm:$0xff] }
  0x7c   : > { %v275_v8 = vld [vmem:[%s3106_s5 + $0x60] sm:$0xff]  ;;  %1814 = vmatpush1.bf16.msra.mxu0 %v2382_v6  ;;  %v3157_v59 = vcombine.high %v3149_v54, %v3149_v54  ;;  %v3161_v60 = vcombine.high %v3151_v55, %v3151_v55 }
  0x7d   : > { %v2391_v11 = vcombine.high %v271_v7, %v275_v8  ;;  %v399_v12 = vld [vmem:[%s3106_s5 + $0x440] sm:$0xff]  ;;  %1854 = vmatprep.subr.bf16.mxu1 %v2511_v9  ;;  %v2390_v19 = vcombine.low %v271_v7, %v275_v8 }
  0x7e   : > { %v403_v13 = vld [vmem:[%s3106_s5 + $0x460] sm:$0xff]  ;;  %1855 = vmatpush1.bf16.msra.mxu1 %v2510_v10  ;;  %1845 = vmatprep.mubr.bf16.mxu0 %v3157_v59 }
  0x7f   : > { %v279_v14 = vld [vmem:[%s3106_s5 + $0x80] sm:$0xff]  ;;  %v2519_v15 = vcombine.high %v399_v12, %v403_v13  ;;  %1815 = vmatprep.subr.bf16.mxu0 %v2391_v11  ;;  %v2518_v20 = vcombine.low %v399_v12, %v403_v13  ;;  %1886 = vmatprep.mubr.bf16.mxu1 %v3161_v60 }
  0x80   : > { %v283_v16 = vld [vmem:[%s3106_s5 + $0xa0] sm:$0xff]  ;;  %1816 = vmatpush1.bf16.msra.mxu0 %v2390_v19 }
  0x81   : > { %v407_v17 = vld [vmem:[%s3106_s5 + $0x480] sm:$0xff]  ;;  %v2399_v21 = vcombine.high %v279_v14, %v283_v16  ;;  %1856 = vmatprep.subr.bf16.mxu1 %v2519_v15  ;;  %v2398_v27 = vcombine.low %v279_v14, %v283_v16 }
  0x82   : > { %v411_v18 = vld [vmem:[%s3106_s5 + $0x4a0] sm:$0xff]  ;;  %1857 = vmatpush1.bf16.msra.mxu1 %v2518_v20 }
  0x83   : > { %v2527_v22 = vcombine.high %v407_v17, %v411_v18  ;;  %v287_v23 = vld [vmem:[%s3106_s5 + $0xc0] sm:$0xff]  ;;  %1817 = vmatprep.subr.bf16.mxu0 %v2399_v21  ;;  %v2526_v28 = vcombine.low %v407_v17, %v411_v18 }
  0x84   : > { %v291_v24 = vld [vmem:[%s3106_s5 + $0xe0] sm:$0xff]  ;;  %1818 = vmatpush1.bf16.msra.mxu0 %v2398_v27 }
  0x85   : > { %v415_v25 = vld [vmem:[%s3106_s5 + $0x4c0] sm:$0xff]  ;;  %v2407_v29 = vcombine.high %v287_v23, %v291_v24  ;;  %1858 = vmatprep.subr.bf16.mxu1 %v2527_v22  ;;  %v2406_v35 = vcombine.low %v287_v23, %v291_v24 }
  0x86   : > { %v419_v26 = vld [vmem:[%s3106_s5 + $0x4e0] sm:$0xff]  ;;  %1859 = vmatpush1.bf16.msra.mxu1 %v2526_v28 }
  0x87   : > { %v2535_v30 = vcombine.high %v415_v25, %v419_v26  ;;  %v295_v31 = vld [vmem:[%s3106_s5 + $0x100] sm:$0xff]  ;;  %1819 = vmatprep.subr.bf16.mxu0 %v2407_v29  ;;  %v2534_v36 = vcombine.low %v415_v25, %v419_v26 }
  0x88   : > { %v299_v32 = vld [vmem:[%s3106_s5 + $0x120] sm:$0xff]  ;;  %1820 = vmatpush1.bf16.msra.mxu0 %v2406_v35 }
  0x89   : > { %v423_v33 = vld [vmem:[%s3106_s5 + $0x500] sm:$0xff]  ;;  %v2415_v37 = vcombine.high %v295_v31, %v299_v32  ;;  %1860 = vmatprep.subr.bf16.mxu1 %v2535_v30  ;;  %v2414_v43 = vcombine.low %v295_v31, %v299_v32 }
  0x8a   : > { %v427_v34 = vld [vmem:[%s3106_s5 + $0x520] sm:$0xff]  ;;  %1861 = vmatpush1.bf16.msra.mxu1 %v2534_v36 }
  0x8b   : > { %v2543_v38 = vcombine.high %v423_v33, %v427_v34  ;;  %v303_v39 = vld [vmem:[%s3106_s5 + $0x140] sm:$0xff]  ;;  %1821 = vmatprep.subr.bf16.mxu0 %v2415_v37  ;;  %v2542_v44 = vcombine.low %v423_v33, %v427_v34 }
  0x8c   : > { %v307_v40 = vld [vmem:[%s3106_s5 + $0x160] sm:$0xff]  ;;  %1822 = vmatpush1.bf16.msra.mxu0 %v2414_v43 }
  0x8d   : > { %v431_v41 = vld [vmem:[%s3106_s5 + $0x540] sm:$0xff]  ;;  %v2423_v45 = vcombine.high %v303_v39, %v307_v40  ;;  %1862 = vmatprep.subr.bf16.mxu1 %v2543_v38  ;;  %v2422_v51 = vcombine.low %v303_v39, %v307_v40 }
  0x8e   : > { %v435_v42 = vld [vmem:[%s3106_s5 + $0x560] sm:$0xff]  ;;  %1863 = vmatpush1.bf16.msra.mxu1 %v2542_v44 }
  0x8f   : > { %v2551_v46 = vcombine.high %v431_v41, %v435_v42  ;;  %v311_v47 = vld [vmem:[%s3106_s5 + $0x180] sm:$0xff]  ;;  %1823 = vmatprep.subr.bf16.mxu0 %v2423_v45  ;;  %v2550_v52 = vcombine.low %v431_v41, %v435_v42 }
  0x90   : > { %v315_v48 = vld [vmem:[%s3106_s5 + $0x1a0] sm:$0xff]  ;;  %1824 = vmatpush1.bf16.msra.mxu0 %v2422_v51 }
  0x91   : > { %v439_v49 = vld [vmem:[%s3106_s5 + $0x580] sm:$0xff]  ;;  %v2431_v53 = vcombine.high %v311_v47, %v315_v48  ;;  %1864 = vmatprep.subr.bf16.mxu1 %v2551_v46  ;;  %v2430_v63 = vcombine.low %v311_v47, %v315_v48 }
  0x92   : > { %v443_v50 = vld [vmem:[%s3106_s5 + $0x5a0] sm:$0xff]  ;;  %1865 = vmatpush1.bf16.msra.mxu1 %v2550_v52 }
  0x93   : > { %v2559_v56 = vcombine.high %v439_v49, %v443_v50  ;;  %v319_v57 = vld [vmem:[%s3106_s5 + $0x1c0] sm:$0xff]  ;;  %1825 = vmatprep.subr.bf16.mxu0 %v2431_v53  ;;  %v2558_v0 = vcombine.low %v439_v49, %v443_v50 }
  0x94   : > { %v323_v58 = vld [vmem:[%s3106_s5 + $0x1e0] sm:$0xff]  ;;  %1826 = vmatpush1.bf16.msra.mxu0 %v2430_v63 }
  0x95   : > { %v447_v61 = vld [vmem:[%s3106_s5 + $0x5c0] sm:$0xff]  ;;  %v2439_v1 = vcombine.high %v319_v57, %v323_v58  ;;  %1866 = vmatprep.subr.bf16.mxu1 %v2559_v56  ;;  %v2438_v7 = vcombine.low %v319_v57, %v323_v58 }
  0x96   : > { %v451_v62 = vld [vmem:[%s3106_s5 + $0x5e0] sm:$0xff]  ;;  %1867 = vmatpush1.bf16.msra.mxu1 %v2558_v0 }
  0x97   : > { %v2567_v2 = vcombine.high %v447_v61, %v451_v62  ;;  %v327_v3 = vld [vmem:[%s3106_s5 + $0x200] sm:$0xff]  ;;  %1827 = vmatprep.subr.bf16.mxu0 %v2439_v1  ;;  %v2566_v8 = vcombine.low %v447_v61, %v451_v62 }
  0x98   : > { %v331_v4 = vld [vmem:[%s3106_s5 + $0x220] sm:$0xff]  ;;  %1828 = vmatpush1.bf16.msra.mxu0 %v2438_v7  ;;  %v264_v7 = vld [vmem:[%s3106_s5 + $0x8] sm:$0xff] }
  0x99   : > { %v455_v5 = vld [vmem:[%s3106_s5 + $0x600] sm:$0xff]  ;;  %v2447_v9 = vcombine.high %v327_v3, %v331_v4  ;;  %1868 = vmatprep.subr.bf16.mxu1 %v2567_v2  ;;  %v2446_v15 = vcombine.low %v327_v3, %v331_v4 }
  0x9a   : > { %v459_v6 = vld [vmem:[%s3106_s5 + $0x620] sm:$0xff]  ;;  %1869 = vmatpush1.bf16.msra.mxu1 %v2566_v8  ;;  %v268_v8 = vld [vmem:[%s3106_s5 + $0x28] sm:$0xff] }
  0x9b   : > { %v2575_v10 = vcombine.high %v455_v5, %v459_v6  ;;  %v335_v11 = vld [vmem:[%s3106_s5 + $0x240] sm:$0xff]  ;;  %1829 = vmatprep.subr.bf16.mxu0 %v2447_v9  ;;  %v2574_v16 = vcombine.low %v455_v5, %v459_v6  ;;  %v392_v9 = vld [vmem:[%s3106_s5 + $0x408] sm:$0xff] }
  0x9c   : > { %v339_v12 = vld [vmem:[%s3106_s5 + $0x260] sm:$0xff]  ;;  %1830 = vmatpush1.bf16.msra.mxu0 %v2446_v15  ;;  %v272_v15 = vld [vmem:[%s3106_s5 + $0x48] sm:$0xff] }
  0x9d   : > { %v463_v13 = vld [vmem:[%s3106_s5 + $0x640] sm:$0xff]  ;;  %v2455_v17 = vcombine.high %v335_v11, %v339_v12  ;;  %1870 = vmatprep.subr.bf16.mxu1 %v2575_v10  ;;  %v2454_v23 = vcombine.low %v335_v11, %v339_v12  ;;  %v396_v10 = vld [vmem:[%s3106_s5 + $0x428] sm:$0xff] }
  0x9e   : > { %v467_v14 = vld [vmem:[%s3106_s5 + $0x660] sm:$0xff]  ;;  %1871 = vmatpush1.bf16.msra.mxu1 %v2574_v16  ;;  %v276_v16 = vld [vmem:[%s3106_s5 + $0x68] sm:$0xff] }
  0x9f   : > { %v2583_v18 = vcombine.high %v463_v13, %v467_v14  ;;  %v343_v19 = vld [vmem:[%s3106_s5 + $0x280] sm:$0xff]  ;;  %1831 = vmatprep.subr.bf16.mxu0 %v2455_v17  ;;  %v2582_v24 = vcombine.low %v463_v13, %v467_v14  ;;  %v2385_v13 = vcombine.high %v264_v7, %v268_v8  ;;  %v2513_v14 = vcombine.high %v392_v9, %v396_v10 }
  0xa0   : > { %v347_v20 = vld [vmem:[%s3106_s5 + $0x2a0] sm:$0xff]  ;;  %1832 = vmatpush1.bf16.msra.mxu0 %v2454_v23  ;;  %v3207_v17 = vcombine.low %v3149_v54, %v3149_v54  ;;  %v2393_v23 = vcombine.high %v272_v15, %v276_v16  ;;  %v284_v54 = vld [vmem:[%s3106_s5 + $0xa8] sm:$0xff] }
  0xa1   : > { %v471_v21 = vld [vmem:[%s3106_s5 + $0x680] sm:$0xff]  ;;  %v2463_v25 = vcombine.high %v343_v19, %v347_v20  ;;  %1872 = vmatprep.subr.bf16.mxu1 %v2583_v18  ;;  %v2462_v31 = vcombine.low %v343_v19, %v347_v20  ;;  %v400_v18 = vld [vmem:[%s3106_s5 + $0x448] sm:$0xff]  ;;  %v3213_v20 = vcombine.low %v3151_v55, %v3151_v55  ;;  %v2392_v55 = vcombine.low %v272_v15, %v276_v16 }
  0xa2   : > { %v475_v22 = vld [vmem:[%s3106_s5 + $0x6a0] sm:$0xff]  ;;  %1873 = vmatpush1.bf16.msra.mxu1 %v2582_v24  ;;  %v404_v19 = vld [vmem:[%s3106_s5 + $0x468] sm:$0xff] }
  0xa3   : > { %v2591_v26 = vcombine.high %v471_v21, %v475_v22  ;;  %v351_v27 = vld [vmem:[%s3106_s5 + $0x2c0] sm:$0xff]  ;;  %1833 = vmatprep.subr.bf16.mxu0 %v2463_v25  ;;  %v2590_v32 = vcombine.low %v471_v21, %v475_v22  ;;  %v2384_v21 = vcombine.low %v264_v7, %v268_v8  ;;  %v2512_v22 = vcombine.low %v392_v9, %v396_v10  ;;  %v280_v25 = vld [vmem:[%s3106_s5 + $0x88] sm:$0xff] }
  0xa4   : > { %v355_v28 = vld [vmem:[%s3106_s5 + $0x2e0] sm:$0xff]  ;;  %1834 = vmatpush1.bf16.msra.mxu0 %v2462_v31  ;;  %v2521_v24 = vcombine.high %v400_v18, %v404_v19  ;;  %v288_v31 = vld [vmem:[%s3106_s5 + $0xc8] sm:$0xff] }
  0xa5   : > { %v479_v29 = vld [vmem:[%s3106_s5 + $0x6c0] sm:$0xff]  ;;  %v2471_v33 = vcombine.high %v351_v27, %v355_v28  ;;  %1874 = vmatprep.subr.bf16.mxu1 %v2591_v26  ;;  %v2470_v39 = vcombine.low %v351_v27, %v355_v28  ;;  %v408_v26 = vld [vmem:[%s3106_s5 + $0x488] sm:$0xff]  ;;  %v2520_v28 = vcombine.low %v400_v18, %v404_v19 }
  0xa6   : > { %v483_v30 = vld [vmem:[%s3106_s5 + $0x6e0] sm:$0xff]  ;;  %1875 = vmatpush1.bf16.msra.mxu1 %v2590_v32  ;;  %v412_v27 = vld [vmem:[%s3106_s5 + $0x4a8] sm:$0xff] }
  0xa7   : > { %v2599_v34 = vcombine.high %v479_v29, %v483_v30  ;;  %v359_v35 = vld [vmem:[%s3106_s5 + $0x300] sm:$0xff]  ;;  %1835 = vmatprep.subr.bf16.mxu0 %v2471_v33  ;;  %v2598_v40 = vcombine.low %v479_v29, %v483_v30  ;;  %v2401_v29 = vcombine.high %v280_v25, %v284_v54  ;;  %v2529_v30 = vcombine.high %v408_v26, %v412_v27  ;;  %v292_v32 = vld [vmem:[%s3106_s5 + $0xe8] sm:$0xff] }
  0xa8   : > { %v363_v36 = vld [vmem:[%s3106_s5 + $0x320] sm:$0xff]  ;;  %1836 = vmatpush1.bf16.msra.mxu0 %v2470_v39  ;;  %v416_v33 = vld [vmem:[%s3106_s5 + $0x4c8] sm:$0xff] }
  0xa9   : > { %v487_v37 = vld [vmem:[%s3106_s5 + $0x700] sm:$0xff]  ;;  %v2479_v41 = vcombine.high %v359_v35, %v363_v36  ;;  %1876 = vmatprep.subr.bf16.mxu1 %v2599_v34  ;;  %v2478_v47 = vcombine.low %v359_v35, %v363_v36  ;;  %v420_v34 = vld [vmem:[%s3106_s5 + $0x4e8] sm:$0xff]  ;;  %v2400_v35 = vcombine.low %v280_v25, %v284_v54  ;;  %v2528_v36 = vcombine.low %v408_v26, %v412_v27 }
  0xaa   : > { %v491_v38 = vld [vmem:[%s3106_s5 + $0x720] sm:$0xff]  ;;  %1877 = vmatpush1.bf16.msra.mxu1 %v2598_v40  ;;  %v296_v39 = vld [vmem:[%s3106_s5 + $0x108] sm:$0xff] }
  0xab   : > { %v2607_v42 = vcombine.high %v487_v37, %v491_v38  ;;  %v367_v43 = vld [vmem:[%s3106_s5 + $0x340] sm:$0xff]  ;;  %1837 = vmatprep.subr.bf16.mxu0 %v2479_v41  ;;  %v2606_v48 = vcombine.low %v487_v37, %v491_v38  ;;  %v2409_v37 = vcombine.high %v288_v31, %v292_v32  ;;  %v2537_v38 = vcombine.high %v416_v33, %v420_v34  ;;  %v300_v40 = vld [vmem:[%s3106_s5 + $0x128] sm:$0xff] }
  0xac   : > { %v371_v44 = vld [vmem:[%s3106_s5 + $0x360] sm:$0xff]  ;;  %1838 = vmatpush1.bf16.msra.mxu0 %v2478_v47  ;;  %v424_v41 = vld [vmem:[%s3106_s5 + $0x508] sm:$0xff] }
  0xad   : > { %v495_v45 = vld [vmem:[%s3106_s5 + $0x740] sm:$0xff]  ;;  %v2487_v49 = vcombine.high %v367_v43, %v371_v44  ;;  %1878 = vmatprep.subr.bf16.mxu1 %v2607_v42  ;;  %v2486_v57 = vcombine.low %v367_v43, %v371_v44  ;;  %v428_v42 = vld [vmem:[%s3106_s5 + $0x528] sm:$0xff]  ;;  %v2408_v43 = vcombine.low %v288_v31, %v292_v32  ;;  %v2536_v44 = vcombine.low %v416_v33, %v420_v34 }
  0xae   : > { %v499_v46 = vld [vmem:[%s3106_s5 + $0x760] sm:$0xff]  ;;  %1879 = vmatpush1.bf16.msra.mxu1 %v2606_v48  ;;  %v304_v47 = vld [vmem:[%s3106_s5 + $0x148] sm:$0xff] }
  0xaf   : > { %v2615_v50 = vcombine.high %v495_v45, %v499_v46  ;;  %v375_v51 = vld [vmem:[%s3106_s5 + $0x380] sm:$0xff]  ;;  %1839 = vmatprep.subr.bf16.mxu0 %v2487_v49  ;;  %v2614_v58 = vcombine.low %v495_v45, %v499_v46  ;;  %v2417_v45 = vcombine.high %v296_v39, %v300_v40  ;;  %v2545_v46 = vcombine.high %v424_v41, %v428_v42  ;;  %v308_v48 = vld [vmem:[%s3106_s5 + $0x168] sm:$0xff] }
  0xb0   : > { %v379_v52 = vld [vmem:[%s3106_s5 + $0x3a0] sm:$0xff]  ;;  %1840 = vmatpush1.bf16.msra.mxu0 %v2486_v57  ;;  %v432_v49 = vld [vmem:[%s3106_s5 + $0x548] sm:$0xff] }
  0xb1   : > { %v503_v53 = vld [vmem:[%s3106_s5 + $0x780] sm:$0xff]  ;;  %v2495_v61 = vcombine.high %v375_v51, %v379_v52  ;;  %1880 = vmatprep.subr.bf16.mxu1 %v2615_v50  ;;  %v2494_v3 = vcombine.low %v375_v51, %v379_v52  ;;  %v436_v50 = vld [vmem:[%s3106_s5 + $0x568] sm:$0xff]  ;;  %v2416_v51 = vcombine.low %v296_v39, %v300_v40  ;;  %v2544_v52 = vcombine.low %v424_v41, %v428_v42 }
  0xb2   : > { %v507_v56 = vld [vmem:[%s3106_s5 + $0x7a0] sm:$0xff]  ;;  %1881 = vmatpush1.bf16.msra.mxu1 %v2614_v58  ;;  %v312_v57 = vld [vmem:[%s3106_s5 + $0x188] sm:$0xff] }
  0xb3   : > { %v2623_v62 = vcombine.high %v503_v53, %v507_v56  ;;  %v383_v63 = vld [vmem:[%s3106_s5 + $0x3c0] sm:$0xff]  ;;  %1841 = vmatprep.subr.bf16.mxu0 %v2495_v61  ;;  %v2622_v4 = vcombine.low %v503_v53, %v507_v56  ;;  %v2425_v53 = vcombine.high %v304_v47, %v308_v48  ;;  %v2553_v56 = vcombine.high %v432_v49, %v436_v50  ;;  %v316_v58 = vld [vmem:[%s3106_s5 + $0x1a8] sm:$0xff] }
  0xb4   : > { %v387_v0 = vld [vmem:[%s3106_s5 + $0x3e0] sm:$0xff]  ;;  %1842 = vmatpush1.bf16.msra.mxu0 %v2494_v3  ;;  %v440_v61 = vld [vmem:[%s3106_s5 + $0x588] sm:$0xff]  ;;  %v2432_v7 = vcombine.low %v312_v57, %v316_v58 }
  0xb5   : > { %v511_v1 = vld [vmem:[%s3106_s5 + $0x7c0] sm:$0xff]  ;;  %v2503_v5 = vcombine.high %v383_v63, %v387_v0  ;;  %1882 = vmatprep.subr.bf16.mxu1 %v2623_v62  ;;  %v2502_v11 = vcombine.low %v383_v63, %v387_v0  ;;  %v444_v62 = vld [vmem:[%s3106_s5 + $0x5a8] sm:$0xff]  ;;  %v2424_v63 = vcombine.low %v304_v47, %v308_v48  ;;  %v2552_v0 = vcombine.low %v432_v49, %v436_v50 }
  0xb6   : > { %v515_v2 = vld [vmem:[%s3106_s5 + $0x7e0] sm:$0xff]  ;;  %1883 = vmatpush1.bf16.msra.mxu1 %v2622_v4  ;;  %v320_v3 = vld [vmem:[%s3106_s5 + $0x1c8] sm:$0xff]  ;;  %v2560_v8 = vcombine.low %v440_v61, %v444_v62 }
  0xb7   : > { %v2631_v6 = vcombine.high %v511_v1, %v515_v2  ;;  %1843 = vmatprep.subr.bf16.mxu0 %v2503_v5  ;;  %v2630_v12 = vcombine.low %v511_v1, %v515_v2  ;;  %v2433_v1 = vcombine.high %v312_v57, %v316_v58  ;;  %v2561_v2 = vcombine.high %v440_v61, %v444_v62  ;;  %v324_v4 = vld [vmem:[%s3106_s5 + $0x1e8] sm:$0xff] }
  0xb8   : > { %1844 = vmatpush1.bf16.msra.mxu0 %v2502_v11  ;;  %v448_v5 = vld [vmem:[%s3106_s5 + $0x5c8] sm:$0xff]  ;;  %v2441_v9 = vcombine.high %v320_v3, %v324_v4  ;;  %v2440_v15 = vcombine.low %v320_v3, %v324_v4 }
  0xb9   : > { %1884 = vmatprep.subr.bf16.mxu1 %v2631_v6  ;;  %1895 = vmatprep.subr.bf16.mxu0 %v2385_v13  ;;  %v452_v6 = vld [vmem:[%s3106_s5 + $0x5e8] sm:$0xff] }
  0xba   : > { %1885 = vmatpush1.bf16.msra.mxu1 %v2630_v12  ;;  %v2569_v10 = vcombine.high %v448_v5, %v452_v6  ;;  %v328_v11 = vld [vmem:[%s3106_s5 + $0x208] sm:$0xff]  ;;  %v2568_v16 = vcombine.low %v448_v5, %v452_v6 }
  0xbb   : > { %1936 = vmatprep.subr.bf16.mxu1 %v2513_v14  ;;  %1846 = vmatmul.mubr.bf16.vlgmr.msra.gmra.mrb[0].mxu0 %v3207_v17  ;;  %v332_v12 = vld [vmem:[%s3106_s5 + $0x228] sm:$0xff] }
  0xbc   : > { %1896 = vmatpush1.bf16.msra.mxu0 %v2384_v21  ;;  %1927 = vmatprep.mubr.bf16.mxu0 %v3157_v59  ;;  %v456_v13 = vld [vmem:[%s3106_s5 + $0x608] sm:$0xff]  ;;  %v2449_v18 = vcombine.high %v328_v11, %v332_v12  ;;  %v2448_v25 = vcombine.low %v328_v11, %v332_v12 }
  0xbd   : > { %1887 = vmatmul.mubr.bf16.vlgmr.msra.gmra.mrb[0].mxu1 %v3213_v20  ;;  %1897 = vmatprep.subr.bf16.mxu0 %v2393_v23  ;;  %v460_v14 = vld [vmem:[%s3106_s5 + $0x628] sm:$0xff] }
  0xbe   : > { %1937 = vmatpush1.bf16.msra.mxu1 %v2512_v22  ;;  %1968 = vmatprep.mubr.bf16.mxu1 %v3161_v60  ;;  %v2577_v19 = vcombine.high %v456_v13, %v460_v14  ;;  %v336_v21 = vld [vmem:[%s3106_s5 + $0x248] sm:$0xff]  ;;  %v2576_v54 = vcombine.low %v456_v13, %v460_v14 }
  0xbf   : > { %1938 = vmatprep.subr.bf16.mxu1 %v2521_v24  ;;  %v340_v22 = vld [vmem:[%s3106_s5 + $0x268] sm:$0xff] }
  0xc0   : > { %1898 = vmatpush1.bf16.msra.mxu0 %v2392_v55  ;;  %v464_v23 = vld [vmem:[%s3106_s5 + $0x648] sm:$0xff]  ;;  %v2457_v26 = vcombine.high %v336_v21, %v340_v22  ;;  %v2456_v31 = vcombine.low %v336_v21, %v340_v22 }
  0xc1   : > { %1899 = vmatprep.subr.bf16.mxu0 %v2401_v29  ;;  %v468_v24 = vld [vmem:[%s3106_s5 + $0x668] sm:$0xff] }
  0xc2   : > { %1939 = vmatpush1.bf16.msra.mxu1 %v2520_v28  ;;  %v2585_v27 = vcombine.high %v464_v23, %v468_v24  ;;  %v344_v55 = vld [vmem:[%s3106_s5 + $0x288] sm:$0xff]  ;;  %v2584_v32 = vcombine.low %v464_v23, %v468_v24 }
  0xc3   : > { %1940 = vmatprep.subr.bf16.mxu1 %v2529_v30  ;;  %v348_v28 = vld [vmem:[%s3106_s5 + $0x2a8] sm:$0xff] }
  0xc4   : > { %1900 = vmatpush1.bf16.msra.mxu0 %v2400_v35  ;;  %v472_v29 = vld [vmem:[%s3106_s5 + $0x688] sm:$0xff]  ;;  %v2465_v33 = vcombine.high %v344_v55, %v348_v28  ;;  %v2464_v39 = vcombine.low %v344_v55, %v348_v28 }
  0xc5   : > { %1901 = vmatprep.subr.bf16.mxu0 %v2409_v37  ;;  %v476_v30 = vld [vmem:[%s3106_s5 + $0x6a8] sm:$0xff] }
  0xc6   : > { %1941 = vmatpush1.bf16.msra.mxu1 %v2528_v36  ;;  %v2593_v34 = vcombine.high %v472_v29, %v476_v30  ;;  %v352_v35 = vld [vmem:[%s3106_s5 + $0x2c8] sm:$0xff]  ;;  %v2592_v40 = vcombine.low %v472_v29, %v476_v30 }
  0xc7   : > { %1942 = vmatprep.subr.bf16.mxu1 %v2537_v38  ;;  %v356_v36 = vld [vmem:[%s3106_s5 + $0x2e8] sm:$0xff] }
  0xc8   : > { %1902 = vmatpush1.bf16.msra.mxu0 %v2408_v43  ;;  %v480_v37 = vld [vmem:[%s3106_s5 + $0x6c8] sm:$0xff]  ;;  %v2473_v41 = vcombine.high %v352_v35, %v356_v36  ;;  %v2472_v47 = vcombine.low %v352_v35, %v356_v36 }
  0xc9   : > { %1903 = vmatprep.subr.bf16.mxu0 %v2417_v45  ;;  %v484_v38 = vld [vmem:[%s3106_s5 + $0x6e8] sm:$0xff] }
  0xca   : > { %1943 = vmatpush1.bf16.msra.mxu1 %v2536_v44  ;;  %v2601_v42 = vcombine.high %v480_v37, %v484_v38  ;;  %v360_v43 = vld [vmem:[%s3106_s5 + $0x308] sm:$0xff]  ;;  %v2600_v48 = vcombine.low %v480_v37, %v484_v38 }
  0xcb   : > { %1944 = vmatprep.subr.bf16.mxu1 %v2545_v46  ;;  %v364_v44 = vld [vmem:[%s3106_s5 + $0x328] sm:$0xff] }
  0xcc   : > { %1904 = vmatpush1.bf16.msra.mxu0 %v2416_v51  ;;  %v488_v45 = vld [vmem:[%s3106_s5 + $0x708] sm:$0xff]  ;;  %v2481_v49 = vcombine.high %v360_v43, %v364_v44  ;;  %v2480_v57 = vcombine.low %v360_v43, %v364_v44 }
  0xcd   : > { %1905 = vmatprep.subr.bf16.mxu0 %v2425_v53  ;;  %v492_v46 = vld [vmem:[%s3106_s5 + $0x728] sm:$0xff] }
  0xce   : > { %1945 = vmatpush1.bf16.msra.mxu1 %v2544_v52  ;;  %v2609_v50 = vcombine.high %v488_v45, %v492_v46  ;;  %v368_v51 = vld [vmem:[%s3106_s5 + $0x348] sm:$0xff]  ;;  %v2608_v58 = vcombine.low %v488_v45, %v492_v46 }
  0xcf   : > { %1946 = vmatprep.subr.bf16.mxu1 %v2553_v56  ;;  %v372_v52 = vld [vmem:[%s3106_s5 + $0x368] sm:$0xff] }
  0xd0   : > { %1906 = vmatpush1.bf16.msra.mxu0 %v2424_v63  ;;  %v496_v53 = vld [vmem:[%s3106_s5 + $0x748] sm:$0xff]  ;;  %v2489_v61 = vcombine.high %v368_v51, %v372_v52  ;;  %v2488_v3 = vcombine.low %v368_v51, %v372_v52 }
  0xd1   : > { %1907 = vmatprep.subr.bf16.mxu0 %v2433_v1  ;;  %v500_v56 = vld [vmem:[%s3106_s5 + $0x768] sm:$0xff] }
  0xd2   : > { %1947 = vmatpush1.bf16.msra.mxu1 %v2552_v0  ;;  %v2617_v62 = vcombine.high %v496_v53, %v500_v56  ;;  %v376_v63 = vld [vmem:[%s3106_s5 + $0x388] sm:$0xff]  ;;  %v2616_v4 = vcombine.low %v496_v53, %v500_v56 }
  0xd3   : > { %1948 = vmatprep.subr.bf16.mxu1 %v2561_v2  ;;  %v380_v0 = vld [vmem:[%s3106_s5 + $0x3a8] sm:$0xff] }
  0xd4   : > { %1908 = vmatpush1.bf16.msra.mxu0 %v2432_v7  ;;  %v504_v1 = vld [vmem:[%s3106_s5 + $0x788] sm:$0xff]  ;;  %v2497_v5 = vcombine.high %v376_v63, %v380_v0  ;;  %v2496_v11 = vcombine.low %v376_v63, %v380_v0 }
  0xd5   : > { %1909 = vmatprep.subr.bf16.mxu0 %v2441_v9  ;;  %v508_v2 = vld [vmem:[%s3106_s5 + $0x7a8] sm:$0xff] }
  0xd6   : > { %1949 = vmatpush1.bf16.msra.mxu1 %v2560_v8  ;;  %v2625_v6 = vcombine.high %v504_v1, %v508_v2  ;;  %v384_v7 = vld [vmem:[%s3106_s5 + $0x3c8] sm:$0xff]  ;;  %v2624_v12 = vcombine.low %v504_v1, %v508_v2 }
  0xd7   : > { %1950 = vmatprep.subr.bf16.mxu1 %v2569_v10  ;;  %v388_v8 = vld [vmem:[%s3106_s5 + $0x3e8] sm:$0xff] }
  0xd8   : > { %1910 = vmatpush1.bf16.msra.mxu0 %v2440_v15  ;;  %v512_v9 = vld [vmem:[%s3106_s5 + $0x7c8] sm:$0xff]  ;;  %v2505_v13 = vcombine.high %v384_v7, %v388_v8  ;;  %v265_v15 = vld [vmem:[%s3106_s5 + $0x10] sm:$0xff]  ;;  %v2504_v21 = vcombine.low %v384_v7, %v388_v8 }
  0xd9   : > { %1911 = vmatprep.subr.bf16.mxu0 %v2449_v18  ;;  %v516_v10 = vld [vmem:[%s3106_s5 + $0x7e8] sm:$0xff]  ;;  %v393_v18 = vld [vmem:[%s3106_s5 + $0x410] sm:$0xff] }
  0xda   : > { %1951 = vmatpush1.bf16.msra.mxu1 %v2568_v16  ;;  %v2633_v14 = vcombine.high %v512_v9, %v516_v10  ;;  %v269_v16 = vld [vmem:[%s3106_s5 + $0x30] sm:$0xff]  ;;  %v2632_v22 = vcombine.low %v512_v9, %v516_v10 }
  0xdb   : > { %1952 = vmatprep.subr.bf16.mxu1 %v2577_v19  ;;  %v397_v19 = vld [vmem:[%s3106_s5 + $0x430] sm:$0xff]  ;;  %v2387_v23 = vcombine.high %v265_v15, %v269_v16  ;;  %v2386_v55 = vcombine.low %v265_v15, %v269_v16 }
  0xdc   : > { %1912 = vmatpush1.bf16.msra.mxu0 %v2448_v25  ;;  %v2515_v24 = vcombine.high %v393_v18, %v397_v19  ;;  %v273_v25 = vld [vmem:[%s3106_s5 + $0x50] sm:$0xff]  ;;  %v2514_v28 = vcombine.low %v393_v18, %v397_v19 }
  0xdd   : > { %1913 = vmatprep.subr.bf16.mxu0 %v2457_v26  ;;  %v401_v26 = vld [vmem:[%s3106_s5 + $0x450] sm:$0xff] }
  0xde   : > { %1953 = vmatpush1.bf16.msra.mxu1 %v2576_v54  ;;  %v277_v54 = vld [vmem:[%s3106_s5 + $0x70] sm:$0xff] }
  0xdf   : > { %1954 = vmatprep.subr.bf16.mxu1 %v2585_v27  ;;  %v405_v27 = vld [vmem:[%s3106_s5 + $0x470] sm:$0xff]  ;;  %v2395_v29 = vcombine.high %v273_v25, %v277_v54  ;;  %v2394_v35 = vcombine.low %v273_v25, %v277_v54 }
  0xe0   : > { %1914 = vmatpush1.bf16.msra.mxu0 %v2456_v31  ;;  %v2523_v30 = vcombine.high %v401_v26, %v405_v27  ;;  %v281_v31 = vld [vmem:[%s3106_s5 + $0x90] sm:$0xff]  ;;  %v2522_v36 = vcombine.low %v401_v26, %v405_v27 }
  0xe1   : > { %1915 = vmatprep.subr.bf16.mxu0 %v2465_v33  ;;  %v409_v33 = vld [vmem:[%s3106_s5 + $0x490] sm:$0xff] }
  0xe2   : > { %1955 = vmatpush1.bf16.msra.mxu1 %v2584_v32  ;;  %v285_v32 = vld [vmem:[%s3106_s5 + $0xb0] sm:$0xff] }
  0xe3   : > { %1956 = vmatprep.subr.bf16.mxu1 %v2593_v34  ;;  %v413_v34 = vld [vmem:[%s3106_s5 + $0x4b0] sm:$0xff]  ;;  %v2403_v37 = vcombine.high %v281_v31, %v285_v32  ;;  %v2402_v43 = vcombine.low %v281_v31, %v285_v32 }
  0xe4   : > { %1916 = vmatpush1.bf16.msra.mxu0 %v2464_v39  ;;  %v2531_v38 = vcombine.high %v409_v33, %v413_v34  ;;  %v289_v39 = vld [vmem:[%s3106_s5 + $0xd0] sm:$0xff]  ;;  %v2530_v44 = vcombine.low %v409_v33, %v413_v34 }
  0xe5   : > { %1917 = vmatprep.subr.bf16.mxu0 %v2473_v41  ;;  %v417_v41 = vld [vmem:[%s3106_s5 + $0x4d0] sm:$0xff] }
  0xe6   : > { %1957 = vmatpush1.bf16.msra.mxu1 %v2592_v40  ;;  %v293_v40 = vld [vmem:[%s3106_s5 + $0xf0] sm:$0xff] }
  0xe7   : > { %1958 = vmatprep.subr.bf16.mxu1 %v2601_v42  ;;  %v421_v42 = vld [vmem:[%s3106_s5 + $0x4f0] sm:$0xff]  ;;  %v2411_v45 = vcombine.high %v289_v39, %v293_v40  ;;  %v2410_v51 = vcombine.low %v289_v39, %v293_v40 }
  0xe8   : > { %1918 = vmatpush1.bf16.msra.mxu0 %v2472_v47  ;;  %v2539_v46 = vcombine.high %v417_v41, %v421_v42  ;;  %v297_v47 = vld [vmem:[%s3106_s5 + $0x110] sm:$0xff]  ;;  %v2538_v52 = vcombine.low %v417_v41, %v421_v42 }
  0xe9   : > { %1919 = vmatprep.subr.bf16.mxu0 %v2481_v49  ;;  %v425_v49 = vld [vmem:[%s3106_s5 + $0x510] sm:$0xff] }
  0xea   : > { %1959 = vmatpush1.bf16.msra.mxu1 %v2600_v48  ;;  %v301_v48 = vld [vmem:[%s3106_s5 + $0x130] sm:$0xff] }
  0xeb   : > { %1960 = vmatprep.subr.bf16.mxu1 %v2609_v50  ;;  %v429_v50 = vld [vmem:[%s3106_s5 + $0x530] sm:$0xff]  ;;  %v2419_v53 = vcombine.high %v297_v47, %v301_v48  ;;  %v2418_v63 = vcombine.low %v297_v47, %v301_v48 }
  0xec   : > { %1920 = vmatpush1.bf16.msra.mxu0 %v2480_v57  ;;  %v2547_v56 = vcombine.high %v425_v49, %v429_v50  ;;  %v305_v57 = vld [vmem:[%s3106_s5 + $0x150] sm:$0xff]  ;;  %v2546_v0 = vcombine.low %v425_v49, %v429_v50 }
  0xed   : > { %1921 = vmatprep.subr.bf16.mxu0 %v2489_v61  ;;  %v433_v61 = vld [vmem:[%s3106_s5 + $0x550] sm:$0xff] }
  0xee   : > { %1961 = vmatpush1.bf16.msra.mxu1 %v2608_v58  ;;  %v309_v58 = vld [vmem:[%s3106_s5 + $0x170] sm:$0xff] }
  0xef   : > { %1962 = vmatprep.subr.bf16.mxu1 %v2617_v62  ;;  %v437_v62 = vld [vmem:[%s3106_s5 + $0x570] sm:$0xff]  ;;  %v2427_v1 = vcombine.high %v305_v57, %v309_v58  ;;  %v2426_v7 = vcombine.low %v305_v57, %v309_v58 }
  0xf0   : > { %1922 = vmatpush1.bf16.msra.mxu0 %v2488_v3  ;;  %v2555_v2 = vcombine.high %v433_v61, %v437_v62  ;;  %v313_v3 = vld [vmem:[%s3106_s5 + $0x190] sm:$0xff]  ;;  %v2554_v8 = vcombine.low %v433_v61, %v437_v62 }
  0xf1   : > { %1923 = vmatprep.subr.bf16.mxu0 %v2497_v5  ;;  %v441_v5 = vld [vmem:[%s3106_s5 + $0x590] sm:$0xff] }
  0xf2   : > { %1963 = vmatpush1.bf16.msra.mxu1 %v2616_v4  ;;  %v317_v4 = vld [vmem:[%s3106_s5 + $0x1b0] sm:$0xff] }
  0xf3   : > { %1964 = vmatprep.subr.bf16.mxu1 %v2625_v6  ;;  %v445_v6 = vld [vmem:[%s3106_s5 + $0x5b0] sm:$0xff]  ;;  %v2435_v9 = vcombine.high %v313_v3, %v317_v4  ;;  %v2434_v15 = vcombine.low %v313_v3, %v317_v4 }
  0xf4   : > { %1924 = vmatpush1.bf16.msra.mxu0 %v2496_v11  ;;  %v2563_v10 = vcombine.high %v441_v5, %v445_v6  ;;  %v321_v11 = vld [vmem:[%s3106_s5 + $0x1d0] sm:$0xff]  ;;  %v2562_v16 = vcombine.low %v441_v5, %v445_v6 }
  0xf5   : > { %1925 = vmatprep.subr.bf16.mxu0 %v2505_v13  ;;  %v449_v13 = vld [vmem:[%s3106_s5 + $0x5d0] sm:$0xff] }
  0xf6   : > { %1965 = vmatpush1.bf16.msra.mxu1 %v2624_v12  ;;  %v325_v12 = vld [vmem:[%s3106_s5 + $0x1f0] sm:$0xff] }
  0xf7   : > { %1966 = vmatprep.subr.bf16.mxu1 %v2633_v14  ;;  %v453_v14 = vld [vmem:[%s3106_s5 + $0x5f0] sm:$0xff]  ;;  %v2443_v18 = vcombine.high %v321_v11, %v325_v12  ;;  %v2442_v25 = vcombine.low %v321_v11, %v325_v12 }
  0xf8   : > { %1926 = vmatpush1.bf16.msra.mxu0 %v2504_v21  ;;  %v2571_v19 = vcombine.high %v449_v13, %v453_v14  ;;  %v329_v21 = vld [vmem:[%s3106_s5 + $0x210] sm:$0xff]  ;;  %v2570_v54 = vcombine.low %v449_v13, %v453_v14 }
  0xf9   : > { %1977 = vmatprep.subr.bf16.mxu0 %v2387_v23  ;;  %v457_v23 = vld [vmem:[%s3106_s5 + $0x610] sm:$0xff] }
  0xfa   : > { %1967 = vmatpush1.bf16.msra.mxu1 %v2632_v22  ;;  %v333_v22 = vld [vmem:[%s3106_s5 + $0x230] sm:$0xff] }
  0xfb   : > { %2018 = vmatprep.subr.bf16.mxu1 %v2515_v24  ;;  %1928 = vmatmul.mubr.bf16.vlgmr.msra.gmra.mrb[4].mxu0 %v3207_v17  ;;  %v461_v24 = vld [vmem:[%s3106_s5 + $0x630] sm:$0xff]  ;;  %v2451_v26 = vcombine.high %v329_v21, %v333_v22  ;;  %v2450_v31 = vcombine.low %v329_v21, %v333_v22 }
  0xfc   : > { %1978 = vmatpush1.bf16.msra.mxu0 %v2386_v55  ;;  %2009 = vmatprep.mubr.bf16.mxu0 %v3157_v59  ;;  %v2579_v27 = vcombine.high %v457_v23, %v461_v24  ;;  %v337_v55 = vld [vmem:[%s3106_s5 + $0x250] sm:$0xff]  ;;  %v2578_v32 = vcombine.low %v457_v23, %v461_v24 }
  0xfd   : > { %1969 = vmatmul.mubr.bf16.vlgmr.msra.gmra.mrb[4].mxu1 %v3213_v20  ;;  %1979 = vmatprep.subr.bf16.mxu0 %v2395_v29  ;;  %v465_v29 = vld [vmem:[%s3106_s5 + $0x650] sm:$0xff] }
  0xfe   : > { %2019 = vmatpush1.bf16.msra.mxu1 %v2514_v28  ;;  %2050 = vmatprep.mubr.bf16.mxu1 %v3161_v60  ;;  %v341_v28 = vld [vmem:[%s3106_s5 + $0x270] sm:$0xff] }
  0xff   : > { %2020 = vmatprep.subr.bf16.mxu1 %v2523_v30  ;;  %v469_v30 = vld [vmem:[%s3106_s5 + $0x670] sm:$0xff]  ;;  %v2459_v33 = vcombine.high %v337_v55, %v341_v28  ;;  %v2458_v39 = vcombine.low %v337_v55, %v341_v28 }
 0x100   : > { %1980 = vmatpush1.bf16.msra.mxu0 %v2394_v35  ;;  %v2587_v34 = vcombine.high %v465_v29, %v469_v30  ;;  %v345_v35 = vld [vmem:[%s3106_s5 + $0x290] sm:$0xff]  ;;  %v2586_v40 = vcombine.low %v465_v29, %v469_v30 }
 0x101   : > { %1981 = vmatprep.subr.bf16.mxu0 %v2403_v37  ;;  %v473_v37 = vld [vmem:[%s3106_s5 + $0x690] sm:$0xff] }
 0x102   : > { %2021 = vmatpush1.bf16.msra.mxu1 %v2522_v36  ;;  %v349_v36 = vld [vmem:[%s3106_s5 + $0x2b0] sm:$0xff] }
 0x103   : > { %2022 = vmatprep.subr.bf16.mxu1 %v2531_v38  ;;  %v477_v38 = vld [vmem:[%s3106_s5 + $0x6b0] sm:$0xff]  ;;  %v2467_v41 = vcombine.high %v345_v35, %v349_v36  ;;  %v2466_v47 = vcombine.low %v345_v35, %v349_v36 }
 0x104   : > { %1982 = vmatpush1.bf16.msra.mxu0 %v2402_v43  ;;  %v2595_v42 = vcombine.high %v473_v37, %v477_v38  ;;  %v353_v43 = vld [vmem:[%s3106_s5 + $0x2d0] sm:$0xff]  ;;  %v2594_v48 = vcombine.low %v473_v37, %v477_v38 }
 0x105   : > { %1983 = vmatprep.subr.bf16.mxu0 %v2411_v45  ;;  %v481_v45 = vld [vmem:[%s3106_s5 + $0x6d0] sm:$0xff] }
 0x106   : > { %2023 = vmatpush1.bf16.msra.mxu1 %v2530_v44  ;;  %v357_v44 = vld [vmem:[%s3106_s5 + $0x2f0] sm:$0xff] }
 0x107   : > { %2024 = vmatprep.subr.bf16.mxu1 %v2539_v46  ;;  %v485_v46 = vld [vmem:[%s3106_s5 + $0x6f0] sm:$0xff]  ;;  %v2475_v49 = vcombine.high %v353_v43, %v357_v44  ;;  %v2474_v57 = vcombine.low %v353_v43, %v357_v44 }
 0x108   : > { %1984 = vmatpush1.bf16.msra.mxu0 %v2410_v51  ;;  %v2603_v50 = vcombine.high %v481_v45, %v485_v46  ;;  %v361_v51 = vld [vmem:[%s3106_s5 + $0x310] sm:$0xff]  ;;  %v2602_v58 = vcombine.low %v481_v45, %v485_v46 }
 0x109   : > { %1985 = vmatprep.subr.bf16.mxu0 %v2419_v53  ;;  %v489_v53 = vld [vmem:[%s3106_s5 + $0x710] sm:$0xff] }
 0x10a   : > { %2025 = vmatpush1.bf16.msra.mxu1 %v2538_v52  ;;  %v365_v52 = vld [vmem:[%s3106_s5 + $0x330] sm:$0xff] }
 0x10b   : > { %2026 = vmatprep.subr.bf16.mxu1 %v2547_v56  ;;  %v493_v56 = vld [vmem:[%s3106_s5 + $0x730] sm:$0xff]  ;;  %v2483_v61 = vcombine.high %v361_v51, %v365_v52  ;;  %v2482_v3 = vcombine.low %v361_v51, %v365_v52 }
 0x10c   : > { %1986 = vmatpush1.bf16.msra.mxu0 %v2418_v63  ;;  %v2611_v62 = vcombine.high %v489_v53, %v493_v56  ;;  %v369_v63 = vld [vmem:[%s3106_s5 + $0x350] sm:$0xff]  ;;  %v2610_v4 = vcombine.low %v489_v53, %v493_v56 }
 0x10d   : > { %1987 = vmatprep.subr.bf16.mxu0 %v2427_v1  ;;  %v497_v1 = vld [vmem:[%s3106_s5 + $0x750] sm:$0xff] }
 0x10e   : > { %2027 = vmatpush1.bf16.msra.mxu1 %v2546_v0  ;;  %v373_v0 = vld [vmem:[%s3106_s5 + $0x370] sm:$0xff] }
 0x10f   : > { %2028 = vmatprep.subr.bf16.mxu1 %v2555_v2  ;;  %v501_v2 = vld [vmem:[%s3106_s5 + $0x770] sm:$0xff]  ;;  %v2491_v5 = vcombine.high %v369_v63, %v373_v0  ;;  %v2490_v11 = vcombine.low %v369_v63, %v373_v0 }
 0x110   : > { %1988 = vmatpush1.bf16.msra.mxu0 %v2426_v7  ;;  %v2619_v6 = vcombine.high %v497_v1, %v501_v2  ;;  %v377_v7 = vld [vmem:[%s3106_s5 + $0x390] sm:$0xff]  ;;  %v2618_v12 = vcombine.low %v497_v1, %v501_v2  ;;  %v306_v1 = vld [vmem:[%s3106_s5 + $0x158] sm:$0xff] }
 0x111   : > { %1989 = vmatprep.subr.bf16.mxu0 %v2435_v9  ;;  %v505_v9 = vld [vmem:[%s3106_s5 + $0x790] sm:$0xff]  ;;  %v310_v2 = vld [vmem:[%s3106_s5 + $0x178] sm:$0xff] }
 0x112   : > { %2029 = vmatpush1.bf16.msra.mxu1 %v2554_v8  ;;  %v381_v8 = vld [vmem:[%s3106_s5 + $0x3b0] sm:$0xff] }
 0x113   : > { %2030 = vmatprep.subr.bf16.mxu1 %v2563_v10  ;;  %v509_v10 = vld [vmem:[%s3106_s5 + $0x7b0] sm:$0xff]  ;;  %v2499_v13 = vcombine.high %v377_v7, %v381_v8  ;;  %v2498_v21 = vcombine.low %v377_v7, %v381_v8  ;;  %v2429_v7 = vcombine.high %v306_v1, %v310_v2 }
 0x114   : > { %1990 = vmatpush1.bf16.msra.mxu0 %v2434_v15  ;;  %v2627_v14 = vcombine.high %v505_v9, %v509_v10  ;;  %v385_v15 = vld [vmem:[%s3106_s5 + $0x3d0] sm:$0xff]  ;;  %v2626_v22 = vcombine.low %v505_v9, %v509_v10  ;;  %v314_v9 = vld [vmem:[%s3106_s5 + $0x198] sm:$0xff] }
 0x115   : > { %1991 = vmatprep.subr.bf16.mxu0 %v2443_v18  ;;  %v513_v18 = vld [vmem:[%s3106_s5 + $0x7d0] sm:$0xff]  ;;  %v318_v10 = vld [vmem:[%s3106_s5 + $0x1b8] sm:$0xff] }
 0x116   : > { %2031 = vmatpush1.bf16.msra.mxu1 %v2562_v16  ;;  %v389_v16 = vld [vmem:[%s3106_s5 + $0x3f0] sm:$0xff] }
 0x117   : > { %2032 = vmatprep.subr.bf16.mxu1 %v2571_v19  ;;  %v517_v19 = vld [vmem:[%s3106_s5 + $0x7f0] sm:$0xff]  ;;  %v2507_v23 = vcombine.high %v385_v15, %v389_v16  ;;  %v2506_v55 = vcombine.low %v385_v15, %v389_v16  ;;  %v2437_v15 = vcombine.high %v314_v9, %v318_v10 }
 0x118   : > { %1992 = vmatpush1.bf16.msra.mxu0 %v2442_v25  ;;  %v2635_v24 = vcombine.high %v513_v18, %v517_v19  ;;  %v266_v25 = vld [vmem:[%s3106_s5 + $0x18] sm:$0xff]  ;;  %v2634_v28 = vcombine.low %v513_v18, %v517_v19 }
 0x119   : > { %1993 = vmatprep.subr.bf16.mxu0 %v2451_v26  ;;  %v394_v26 = vld [vmem:[%s3106_s5 + $0x418] sm:$0xff] }
 0x11a   : > { %2033 = vmatpush1.bf16.msra.mxu1 %v2570_v54  ;;  %v270_v54 = vld [vmem:[%s3106_s5 + $0x38] sm:$0xff] }
 0x11b   : > { %2034 = vmatprep.subr.bf16.mxu1 %v2579_v27  ;;  %v398_v27 = vld [vmem:[%s3106_s5 + $0x438] sm:$0xff]  ;;  %v2389_v29 = vcombine.high %v266_v25, %v270_v54  ;;  %v2388_v35 = vcombine.low %v266_v25, %v270_v54 }
 0x11c   : > { %1994 = vmatpush1.bf16.msra.mxu0 %v2450_v31  ;;  %v2517_v30 = vcombine.high %v394_v26, %v398_v27  ;;  %v274_v31 = vld [vmem:[%s3106_s5 + $0x58] sm:$0xff]  ;;  %v2516_v36 = vcombine.low %v394_v26, %v398_v27 }
 0x11d   : > { %1995 = vmatprep.subr.bf16.mxu0 %v2459_v33  ;;  %v402_v33 = vld [vmem:[%s3106_s5 + $0x458] sm:$0xff] }
 0x11e   : > { %2035 = vmatpush1.bf16.msra.mxu1 %v2578_v32  ;;  %v278_v32 = vld [vmem:[%s3106_s5 + $0x78] sm:$0xff] }
 0x11f   : > { %2036 = vmatprep.subr.bf16.mxu1 %v2587_v34  ;;  %v406_v34 = vld [vmem:[%s3106_s5 + $0x478] sm:$0xff]  ;;  %v2397_v37 = vcombine.high %v274_v31, %v278_v32  ;;  %v2396_v43 = vcombine.low %v274_v31, %v278_v32 }
 0x120   : > { %1996 = vmatpush1.bf16.msra.mxu0 %v2458_v39  ;;  %v2525_v38 = vcombine.high %v402_v33, %v406_v34  ;;  %v282_v39 = vld [vmem:[%s3106_s5 + $0x98] sm:$0xff]  ;;  %v2524_v44 = vcombine.low %v402_v33, %v406_v34 }
 0x121   : > { %1997 = vmatprep.subr.bf16.mxu0 %v2467_v41  ;;  %v410_v41 = vld [vmem:[%s3106_s5 + $0x498] sm:$0xff] }
 0x122   : > { %2037 = vmatpush1.bf16.msra.mxu1 %v2586_v40  ;;  %v286_v40 = vld [vmem:[%s3106_s5 + $0xb8] sm:$0xff] }
 0x123   : > { %2038 = vmatprep.subr.bf16.mxu1 %v2595_v42  ;;  %v414_v42 = vld [vmem:[%s3106_s5 + $0x4b8] sm:$0xff]  ;;  %v2405_v45 = vcombine.high %v282_v39, %v286_v40  ;;  %v2404_v51 = vcombine.low %v282_v39, %v286_v40 }
 0x124   : > { %1998 = vmatpush1.bf16.msra.mxu0 %v2466_v47  ;;  %v2533_v46 = vcombine.high %v410_v41, %v414_v42  ;;  %v290_v47 = vld [vmem:[%s3106_s5 + $0xd8] sm:$0xff]  ;;  %v2532_v52 = vcombine.low %v410_v41, %v414_v42 }
 0x125   : > { %1999 = vmatprep.subr.bf16.mxu0 %v2475_v49  ;;  %v418_v49 = vld [vmem:[%s3106_s5 + $0x4d8] sm:$0xff] }
 0x126   : > { %2039 = vmatpush1.bf16.msra.mxu1 %v2594_v48  ;;  %v294_v48 = vld [vmem:[%s3106_s5 + $0xf8] sm:$0xff] }
 0x127   : > { %2040 = vmatprep.subr.bf16.mxu1 %v2603_v50  ;;  %v422_v50 = vld [vmem:[%s3106_s5 + $0x4f8] sm:$0xff]  ;;  %v2413_v53 = vcombine.high %v290_v47, %v294_v48 }
 0x128   : > { %2000 = vmatpush1.bf16.msra.mxu0 %v2474_v57  ;;  %v2541_v56 = vcombine.high %v418_v49, %v422_v50  ;;  %v298_v57 = vld [vmem:[%s3106_s5 + $0x118] sm:$0xff] }
 0x129   : > { %2001 = vmatprep.subr.bf16.mxu0 %v2483_v61  ;;  %v426_v61 = vld [vmem:[%s3106_s5 + $0x518] sm:$0xff] }
 0x12a   : > { %2041 = vmatpush1.bf16.msra.mxu1 %v2602_v58  ;;  %v302_v58 = vld [vmem:[%s3106_s5 + $0x138] sm:$0xff] }
 0x12b   : > { %2042 = vmatprep.subr.bf16.mxu1 %v2611_v62  ;;  %v2412_v62 = vcombine.low %v290_v47, %v294_v48  ;;  %v2421_v63 = vcombine.high %v298_v57, %v302_v58  ;;  %v322_v18 = vld [vmem:[%s3106_s5 + $0x1d8] sm:$0xff] }
 0x12c   : > { %2002 = vmatpush1.bf16.msra.mxu0 %v2482_v3  ;;  %v434_v3 = vld [vmem:[%s3106_s5 + $0x558] sm:$0xff] }
 0x12d   : > { %2003 = vmatprep.subr.bf16.mxu0 %v2491_v5  ;;  %v2420_v5 = vcombine.low %v298_v57, %v302_v58  ;;  %v326_v19 = vld [vmem:[%s3106_s5 + $0x1f8] sm:$0xff] }
 0x12e   : > { %2043 = vmatpush1.bf16.msra.mxu1 %v2610_v4  ;;  %v438_v4 = vld [vmem:[%s3106_s5 + $0x578] sm:$0xff]  ;;  %v2445_v25 = vcombine.high %v322_v18, %v326_v19 }
 0x12f   : > { %2044 = vmatprep.subr.bf16.mxu1 %v2619_v6  ;;  %v2557_v8 = vcombine.high %v434_v3, %v438_v4  ;;  %v330_v26 = vld [vmem:[%s3106_s5 + $0x218] sm:$0xff] }
 0x130   : > { %2004 = vmatpush1.bf16.msra.mxu0 %v2490_v11  ;;  %v442_v11 = vld [vmem:[%s3106_s5 + $0x598] sm:$0xff] }
 0x131   : > { %2005 = vmatprep.subr.bf16.mxu0 %v2499_v13  ;;  %v2428_v13 = vcombine.low %v306_v1, %v310_v2  ;;  %v334_v27 = vld [vmem:[%s3106_s5 + $0x238] sm:$0xff] }
 0x132   : > { %2045 = vmatpush1.bf16.msra.mxu1 %v2618_v12  ;;  %v446_v12 = vld [vmem:[%s3106_s5 + $0x5b8] sm:$0xff]  ;;  %v2453_v31 = vcombine.high %v330_v26, %v334_v27 }
 0x133   : > { %2046 = vmatprep.subr.bf16.mxu1 %v2627_v14  ;;  %v2556_v14 = vcombine.low %v434_v3, %v438_v4  ;;  %v2565_v16 = vcombine.high %v442_v11, %v446_v12  ;;  %v338_v33 = vld [vmem:[%s3106_s5 + $0x258] sm:$0xff] }
 0x134   : > { %2006 = vmatpush1.bf16.msra.mxu0 %v2498_v21  ;;  %v450_v21 = vld [vmem:[%s3106_s5 + $0x5d8] sm:$0xff] }
 0x135   : > { %2007 = vmatprep.subr.bf16.mxu0 %v2507_v23  ;;  %v2436_v23 = vcombine.low %v314_v9, %v318_v10  ;;  %v342_v34 = vld [vmem:[%s3106_s5 + $0x278] sm:$0xff] }
 0x136   : > { %2047 = vmatpush1.bf16.msra.mxu1 %v2626_v22  ;;  %v454_v22 = vld [vmem:[%s3106_s5 + $0x5f8] sm:$0xff]  ;;  %v2461_v39 = vcombine.high %v338_v33, %v342_v34 }
 0x137   : > { %2048 = vmatprep.subr.bf16.mxu1 %v2635_v24  ;;  %v2564_v24 = vcombine.low %v442_v11, %v446_v12  ;;  %v2573_v54 = vcombine.high %v450_v21, %v454_v22  ;;  %v346_v41 = vld [vmem:[%s3106_s5 + $0x298] sm:$0xff] }
 0x138   : > { %2008 = vmatpush1.bf16.msra.mxu0 %v2506_v55  ;;  %v458_v55 = vld [vmem:[%s3106_s5 + $0x618] sm:$0xff] }
 0x139   : > { %2059 = vmatprep.subr.bf16.mxu0 %v2389_v29  ;;  %v2444_v29 = vcombine.low %v322_v18, %v326_v19  ;;  %v350_v42 = vld [vmem:[%s3106_s5 + $0x2b8] sm:$0xff] }
 0x13a   : > { %2049 = vmatpush1.bf16.msra.mxu1 %v2634_v28  ;;  %v462_v28 = vld [vmem:[%s3106_s5 + $0x638] sm:$0xff]  ;;  %v2469_v47 = vcombine.high %v346_v41, %v350_v42 }
 0x13b   : > { %2100 = vmatprep.subr.bf16.mxu1 %v2517_v30  ;;  %2010 = vmatmul.mubr.bf16.vlgmr.msra.gmra.mrb[8].mxu0 %v3207_v17  ;;  %v2572_v30 = vcombine.low %v450_v21, %v454_v22  ;;  %v2581_v32 = vcombine.high %v458_v55, %v462_v28  ;;  %v370_v3 = vld [vmem:[%s3106_s5 + $0x358] sm:$0xff] }
 0x13c   : > { %2060 = vmatpush1.bf16.msra.mxu0 %v2388_v35  ;;  %2091 = vmatprep.mubr.bf16.mxu0 %v3157_v59  ;;  %v430_v59 = vld [vmem:[%s3106_s5 + $0x538] sm:$0xff] }
 0x13d   : > { %2051 = vmatmul.mubr.bf16.vlgmr.msra.gmra.mrb[8].mxu1 %v3213_v20  ;;  %2061 = vmatprep.subr.bf16.mxu0 %v2397_v37  ;;  %v2549_v0 = vcombine.high %v426_v61, %v430_v59  ;;  %v2548_v6 = vcombine.low %v426_v61, %v430_v59  ;;  %v466_v35 = vld [vmem:[%s3106_s5 + $0x658] sm:$0xff]  ;;  %v2452_v37 = vcombine.low %v330_v26, %v334_v27 }
 0x13e   : > { %2101 = vmatpush1.bf16.msra.mxu1 %v2516_v36  ;;  %2132 = vmatprep.mubr.bf16.mxu1 %v3161_v60  ;;  %v2540_v60 = vcombine.low %v418_v49, %v422_v50  ;;  %v470_v36 = vld [vmem:[%s3106_s5 + $0x678] sm:$0xff] }
 0x13f   : > { %2102 = vmatprep.subr.bf16.mxu1 %v2525_v38  ;;  %v2580_v38 = vcombine.low %v458_v55, %v462_v28  ;;  %v2589_v40 = vcombine.high %v466_v35, %v470_v36  ;;  %v354_v49 = vld [vmem:[%s3106_s5 + $0x2d8] sm:$0xff] }
 0x140   : > { %2062 = vmatpush1.bf16.msra.mxu0 %v2396_v43  ;;  %v474_v43 = vld [vmem:[%s3106_s5 + $0x698] sm:$0xff] }
 0x141   : > { %2063 = vmatprep.subr.bf16.mxu0 %v2405_v45  ;;  %v2460_v45 = vcombine.low %v338_v33, %v342_v34  ;;  %v358_v50 = vld [vmem:[%s3106_s5 + $0x2f8] sm:$0xff] }
 0x142   : > { %2103 = vmatpush1.bf16.msra.mxu1 %v2524_v44  ;;  %v478_v44 = vld [vmem:[%s3106_s5 + $0x6b8] sm:$0xff]  ;;  %v2477_v57 = vcombine.high %v354_v49, %v358_v50 }
 0x143   : > { %2104 = vmatprep.subr.bf16.mxu1 %v2533_v46  ;;  %v2588_v46 = vcombine.low %v466_v35, %v470_v36  ;;  %v2597_v48 = vcombine.high %v474_v43, %v478_v44  ;;  %v362_v61 = vld [vmem:[%s3106_s5 + $0x318] sm:$0xff] }
 0x144   : > { %2064 = vmatpush1.bf16.msra.mxu0 %v2404_v51  ;;  %v482_v51 = vld [vmem:[%s3106_s5 + $0x6d8] sm:$0xff] }
 0x145   : > { %2065 = vmatprep.subr.bf16.mxu0 %v2413_v53  ;;  %v2468_v53 = vcombine.low %v346_v41, %v350_v42  ;;  %v366_v59 = vld [vmem:[%s3106_s5 + $0x338] sm:$0xff] }
 0x146   : > { %2105 = vmatpush1.bf16.msra.mxu1 %v2532_v52  ;;  %v486_v52 = vld [vmem:[%s3106_s5 + $0x6f8] sm:$0xff]  ;;  %v2485_v1 = vcombine.high %v362_v61, %v366_v59 }
 0x147   : > { %2106 = vmatprep.subr.bf16.mxu1 %v2541_v56  ;;  %v2596_v56 = vcombine.low %v474_v43, %v478_v44  ;;  %v2605_v58 = vcombine.high %v482_v51, %v486_v52  ;;  %v374_v4 = vld [vmem:[%s3106_s5 + $0x378] sm:$0xff] }
 0x148   : > { %2066 = vmatpush1.bf16.msra.mxu0 %v2412_v62  ;;  %v490_v62 = vld [vmem:[%s3106_s5 + $0x718] sm:$0xff]  ;;  %v2493_v9 = vcombine.high %v370_v3, %v374_v4 }
 0x149   : > { %2067 = vmatprep.subr.bf16.mxu0 %v2421_v63  ;;  %v2476_v63 = vcombine.low %v354_v49, %v358_v50  ;;  %v378_v11 = vld [vmem:[%s3106_s5 + $0x398] sm:$0xff] }
 0x14a   : > { %2107 = vmatpush1.bf16.msra.mxu1 %v2540_v60  ;;  %v494_v60 = vld [vmem:[%s3106_s5 + $0x738] sm:$0xff] }
 0x14b   : > { %2108 = vmatprep.subr.bf16.mxu1 %v2549_v0  ;;  %v2604_v0 = vcombine.low %v482_v51, %v486_v52  ;;  %v2613_v2 = vcombine.high %v490_v62, %v494_v60  ;;  %v382_v12 = vld [vmem:[%s3106_s5 + $0x3b8] sm:$0xff] }
 0x14c   : > { %2068 = vmatpush1.bf16.msra.mxu0 %v2420_v5  ;;  %v498_v5 = vld [vmem:[%s3106_s5 + $0x758] sm:$0xff]  ;;  %v2501_v18 = vcombine.high %v378_v11, %v382_v12 }
 0x14d   : > { %2069 = vmatprep.subr.bf16.mxu0 %v2429_v7  ;;  %v2484_v7 = vcombine.low %v362_v61, %v366_v59  ;;  %v386_v21 = vld [vmem:[%s3106_s5 + $0x3d8] sm:$0xff] }
 0x14e   : > { %2109 = vmatpush1.bf16.msra.mxu1 %v2548_v6  ;;  %v502_v6 = vld [vmem:[%s3106_s5 + $0x778] sm:$0xff] }
 0x14f   : > { %2110 = vmatprep.subr.bf16.mxu1 %v2557_v8  ;;  %v2612_v8 = vcombine.low %v490_v62, %v494_v60  ;;  %v2621_v10 = vcombine.high %v498_v5, %v502_v6  ;;  %v390_v22 = vld [vmem:[%s3106_s5 + $0x3f8] sm:$0xff] }
 0x150   : > { %2070 = vmatpush1.bf16.msra.mxu0 %v2428_v13  ;;  %v506_v13 = vld [vmem:[%s3106_s5 + $0x798] sm:$0xff]  ;;  %v2509_v26 = vcombine.high %v386_v21, %v390_v22  ;;  %v2508_v55 = vcombine.low %v386_v21, %v390_v22 }
 0x151   : > { %2071 = vmatprep.subr.bf16.mxu0 %v2437_v15  ;;  %v2492_v15 = vcombine.low %v370_v3, %v374_v4  ;;  %v250_v34 = vld [vmem:[#allocation2 + $0x8] sm:$0xff] }
 0x152   : > { %2111 = vmatpush1.bf16.msra.mxu1 %v2556_v14  ;;  %v510_v14 = vld [vmem:[%s3106_s5 + $0x7b8] sm:$0xff] }
 0x153   : > { %2112 = vmatprep.subr.bf16.mxu1 %v2565_v16  ;;  %v2620_v16 = vcombine.low %v498_v5, %v502_v6  ;;  %v2629_v19 = vcombine.high %v506_v13, %v510_v14  ;;  %v254_v60 = vld [vmem:[#allocation2 + $0x28] sm:$0xff] }
 0x154   : > { %2072 = vmatpush1.bf16.msra.mxu0 %v2436_v23  ;;  %v514_v23 = vld [vmem:[%s3106_s5 + $0x7d8] sm:$0xff] }
 0x155   : > { %2073 = vmatprep.subr.bf16.mxu0 %v2445_v25  ;;  %v2500_v25 = vcombine.low %v378_v11, %v382_v12  ;;  %v256_v12 = vld [vmem:[#allocation2 + $0x38] sm:$0xff] }
 0x156   : > { %2113 = vmatpush1.bf16.msra.mxu1 %v2564_v24  ;;  %v518_v24 = vld [vmem:[%s3106_s5 + $0x7f8] sm:$0xff] }
 0x157   : > { %2114 = vmatprep.subr.bf16.mxu1 %v2573_v54  ;;  %v2628_v54 = vcombine.low %v506_v13, %v510_v14  ;;  %v2637_v27 = vcombine.high %v514_v23, %v518_v24  ;;  %v2636_v28 = vcombine.low %v514_v23, %v518_v24  ;;  %v2171_v23 = vlaneseq (!%p2638_p10) }
 0x158   : > { %2074 = vmatpush1.bf16.msra.mxu0 %v2444_v29 }
 0x159   : > { %2075 = vmatprep.subr.bf16.mxu0 %v2453_v31  ;;  %v2172_v24 = vshrl.u32 (!%p2638_p10), %v2171_v23, 7 }
 0x15a   : > { %2115 = vmatpush1.bf16.msra.mxu1 %v2572_v30  ;;  %v249_v30 = vld [vmem:[#allocation2] sm:$0xff] }
 0x15b   : > { %2116 = vmatprep.subr.bf16.mxu1 %v2581_v32 }
 0x15c   : > { %2076 = vmatpush1.bf16.msra.mxu0 %v2452_v37 }
 0x15d   : > { %2077 = vmatprep.subr.bf16.mxu0 %v2461_v39 }
 0x15e   : > { %2117 = vmatpush1.bf16.msra.mxu1 %v2580_v38 }
 0x15f   : > { %2118 = vmatprep.subr.bf16.mxu1 %v2589_v40 }
 0x160   : > { %2078 = vmatpush1.bf16.msra.mxu0 %v2460_v45 }
 0x161   : > { %2079 = vmatprep.subr.bf16.mxu0 %v2469_v47 }
 0x162   : > { %2119 = vmatpush1.bf16.msra.mxu1 %v2588_v46  ;;  %v252_v46 = vld [vmem:[#allocation2 + $0x18] sm:$0xff] }
 0x163   : > { %2120 = vmatprep.subr.bf16.mxu1 %v2597_v48 }
 0x164   : > { %2080 = vmatpush1.bf16.msra.mxu0 %v2468_v53 }
 0x165   : > { %2081 = vmatprep.subr.bf16.mxu0 %v2477_v57 }
 0x166   : > { %2121 = vmatpush1.bf16.msra.mxu1 %v2596_v56 }
 0x167   : > { %2122 = vmatprep.subr.bf16.mxu1 %v2605_v58  ;;  %v253_v58 = vld [vmem:[#allocation2 + $0x20] sm:$0xff] }
 0x168   : > { %2082 = vmatpush1.bf16.msra.mxu0 %v2476_v63 }
 0x169   : > { %2083 = vmatprep.subr.bf16.mxu0 %v2485_v1 }
 0x16a   : > { %2123 = vmatpush1.bf16.msra.mxu1 %v2604_v0 }
 0x16b   : > { %2124 = vmatprep.subr.bf16.mxu1 %v2613_v2 }
 0x16c   : > { %2084 = vmatpush1.bf16.msra.mxu0 %v2484_v7 }
 0x16d   : > { %2085 = vmatprep.subr.bf16.mxu0 %v2493_v9 }
 0x16e   : > { %2125 = vmatpush1.bf16.msra.mxu1 %v2612_v8  ;;  %v255_v8 = vld [vmem:[#allocation2 + $0x30] sm:$0xff] }
 0x16f   : > { %2126 = vmatprep.subr.bf16.mxu1 %v2621_v10 }
 0x170   : > { %2086 = vmatpush1.bf16.msra.mxu0 %v2492_v15 }
 0x171   : > { %2087 = vmatprep.subr.bf16.mxu0 %v2501_v18 }
 0x172   : > { %2127 = vmatpush1.bf16.msra.mxu1 %v2620_v16 }
 0x173   : > { %2128 = vmatprep.subr.bf16.mxu1 %v2629_v19 }
 0x174   : > { %2088 = vmatpush1.bf16.msra.mxu0 %v2500_v25 }
 0x175   : > { %2089 = vmatprep.subr.bf16.mxu0 %v2509_v26 }
 0x176   : > { %2129 = vmatpush1.bf16.msra.mxu1 %v2628_v54  ;;  %v2169_v54 = vld [vmem:[#allocation8] sm:$0xff] (!%p2638_p10) }
 0x177   : > { %2130 = vmatprep.subr.bf16.mxu1 %v2637_v27  ;;  %v2173_v27 = vsub.s32 (!%p2638_p10), 0, %v2172_v24 }
 0x178   : > { %2090 = vmatpush1.bf16.msra.mxu0 %v2508_v55  ;;  %v2177_v55 = vsub.s32 (!%p2638_p10), 1, %v2172_v24 }
 0x17a   : > { %2131 = vmatpush1.bf16.msra.mxu1 %v2636_v28 }
 0x17b   : > { %2092 = vmatmul.mubr.bf16.vlgmr.msra.gmra.mrb[12].mxu0 %v3207_v17  ;;  %v251_v17 = vld [vmem:[#allocation2 + $0x10] sm:$0xff] }
 0x17d   : > { %2133 = vmatmul.mubr.bf16.vlgmr.msra.gmra.mrb[12].mxu1 %v3213_v20 }
 0x18e   : > { %v1847_v29 = vpop.f32.mrb[0].mxu0 }
 0x18f   : > { %v1849_v32 = vpop.f32.mrb[1].mxu0 }
 0x190   : > { %v1888_v31 = vpop.f32.mrb[0].mxu1  ;;  %v1851_v36 = vpop.f32.mrb[2].mxu0 }
 0x191   : > { %v1889_v33 = vadd.f32 %v1888_v31, %v1847_v29  ;;  %v1890_v35 = vpop.f32.mrb[1].mxu1  ;;  %v1852_v39 = vpop.f32.mrb[3].mxu0  ;;  %v2181_v29 = vsub.s32 (!%p2638_p10), 2, %v2172_v24  ;;  %v2201_v36 = vsub.s32 (!%p2638_p10), 7, %v2172_v24 }
 0x192   : > { %v1891_v37 = vadd.f32 %v1890_v35, %v1849_v32  ;;  %v1892_v38 = vpop.f32.mrb[2].mxu1  ;;  %v2197_v35 = vsub.s32 (!%p2638_p10), 6, %v2172_v24 }
 0x193   : > { %v2141_v40 = vadd.f32 %v1889_v33, %v249_v30  ;;  %v1893_v41 = vpop.f32.mrb[3].mxu1  ;;  %v2185_v30 = vsub.s32 (!%p2638_p10), 3, %v2172_v24  ;;  %v2189_v33 = vsub.s32 (!%p2638_p10), 4, %v2172_v24  ;;  %v2178_v38 = vrot.slane (!%p2638_p10), %v2169_v54, %v2177_v55 }
 0x194   : > { %v2142_v42 = vadd.f32 %v1891_v37, %v250_v34  ;;  %v2193_v34 = vsub.s32 (!%p2638_p10), 5, %v2172_v24  ;;  %v2174_v37 = vrot.slane (!%p2638_p10), %v2169_v54, %v2173_v27  ;;  %v2182_v39 = vrot.slane (!%p2638_p10), %v2169_v54, %v2181_v29 }
 0x195   : > { %2149 = vst [vmem:[#allocation2] sm:$0xff] %v2141_v40  ;;  %v2186_v40 = vrot.slane (!%p2638_p10), %v2169_v54, %v2185_v30 }
 0x196   : > { %2150 = vst [vmem:[#allocation2 + $0x8] sm:$0xff] %v2142_v42 }
 0x19c   : > { %v2161_v25 = vld [vmem:[#allocation2] sm:$0xff] (!%p2638_p10) }
 0x19d   : > { %v2162_v26 = vld [vmem:[#allocation2 + $0x8] sm:$0xff] (!%p2638_p10) }
 0x1ce   : > { %v1929_v43 = vpop.f32.mrb[4].mxu0 }
 0x1cf   : > { %v1931_v20 = vpop.f32.mrb[5].mxu0 }
 0x1d0   : > { %v1970_v44 = vpop.f32.mrb[4].mxu1  ;;  %v1933_v48 = vpop.f32.mrb[6].mxu0 }
 0x1d1   : > { %v1971_v45 = vadd.f32 %v1970_v44, %v1929_v43  ;;  %v1972_v47 = vpop.f32.mrb[5].mxu1  ;;  %v1934_v51 = vpop.f32.mrb[7].mxu0  ;;  %v2194_v44 = vrot.slane (!%p2638_p10), %v2169_v54, %v2193_v34 }
 0x1d2   : > { %v1973_v49 = vadd.f32 %v1972_v47, %v1931_v20  ;;  %v1974_v50 = vpop.f32.mrb[6].mxu1  ;;  %v2198_v20 = vrot.slane (!%p2638_p10), %v2169_v54, %v2197_v35  ;;  %v2212_v47 = vadd.f32 (!%p2638_p10), %v2178_v38, %v2162_v26 }
 0x1d3   : > { %v2143_v52 = vadd.f32 %v1971_v45, %v251_v17  ;;  %v1975_v53 = vpop.f32.mrb[7].mxu1  ;;  %v2190_v17 = vrot.slane (!%p2638_p10), %v2169_v54, %v2189_v33  ;;  %v2202_v45 = vrot.slane (!%p2638_p10), %v2169_v54, %v2201_v36 }
 0x1d4   : > { %v2144_v56 = vadd.f32 %v1973_v49, %v252_v46  ;;  %v2211_v46 = vadd.f32 (!%p2638_p10), %v2174_v37, %v2161_v25 }
 0x1d5   : > { %2151 = vst [vmem:[#allocation2 + $0x10] sm:$0xff] %v2143_v52 }
 0x1d6   : > { %2152 = vst [vmem:[#allocation2 + $0x18] sm:$0xff] %v2144_v56  ;;  %v2219_v56 = vmax.f32 (!%p2638_p10), %v2211_v46, 0.0 }
 0x1dc   : > { %v2163_v28 = vld [vmem:[#allocation2 + $0x10] sm:$0xff] (!%p2638_p10) }
 0x1dd   : > { %v2164_v31 = vld [vmem:[#allocation2 + $0x18] sm:$0xff] (!%p2638_p10)  ;;  %v2213_v48 = vadd.f32 (!%p2638_p10), %v2182_v39, %v2163_v28 }
 0x1de   : > { %v2214_v49 = vadd.f32 (!%p2638_p10), %v2186_v40, %v2164_v31 }
 0x20e   : > { %v2011_v57 = vpop.f32.mrb[8].mxu0 }
 0x20f   : > { %v2013_v59 = vpop.f32.mrb[9].mxu0 }
 0x210   : > { %v2052_v61 = vpop.f32.mrb[8].mxu1  ;;  %v2015_v0 = vpop.f32.mrb[10].mxu0 }
 0x211   : > { %v2053_v62 = vadd.f32 %v2052_v61, %v2011_v57  ;;  %v2054_v63 = vpop.f32.mrb[9].mxu1  ;;  %v2016_v3 = vpop.f32.mrb[11].mxu0  ;;  %v2220_v57 = vmax.f32 (!%p2638_p10), %v2212_v47, 0.0  ;;  %v2222_v61 = vmax.f32 (!%p2638_p10), %v2214_v49, 0.0 }
 0x212   : > { %v2055_v1 = vadd.f32 %v2054_v63, %v2013_v59  ;;  %v2056_v2 = vpop.f32.mrb[10].mxu1 }
 0x213   : > { %v2145_v4 = vadd.f32 %v2053_v62, %v253_v58  ;;  %v2057_v5 = vpop.f32.mrb[11].mxu1  ;;  %v2221_v58 = vmax.f32 (!%p2638_p10), %v2213_v48, 0.0  ;;  %v2649_v0 = vpack.c.bf16 (!%p2638_p10), %v2220_v57, %v2219_v56 }
 0x214   : > { %v2146_v6 = vadd.f32 %v2055_v1, %v254_v60 }
 0x215   : > { %2153 = vst [vmem:[#allocation2 + $0x20] sm:$0xff] %v2145_v4  ;;  %v2650_v1 = vpack.c.bf16 (!%p2638_p10), %v2222_v61, %v2221_v58  ;;  %2259 = vst [vmem:[#allocation9] sm:$0xff] (!%p2638_p10), %v2649_v0 }
 0x216   : > { %2154 = vst [vmem:[#allocation2 + $0x28] sm:$0xff] %v2146_v6 }
 0x217   : > { %2260 = vst [vmem:[#allocation9 + $0x8] sm:$0xff] (!%p2638_p10), %v2650_v1 }
 0x21c   : > { %v2165_v32 = vld [vmem:[#allocation2 + $0x20] sm:$0xff] (!%p2638_p10) }
 0x21d   : > { %v2166_v41 = vld [vmem:[#allocation2 + $0x28] sm:$0xff] (!%p2638_p10)  ;;  %v2215_v50 = vadd.f32 (!%p2638_p10), %v2190_v17, %v2165_v32 }
 0x21e   : > { %v2216_v51 = vadd.f32 (!%p2638_p10), %v2194_v44, %v2166_v41 }
 0x21f   : > { %v2223_v59 = vmax.f32 (!%p2638_p10), %v2215_v50, 0.0 }
 0x220   : > { %v2224_v62 = vmax.f32 (!%p2638_p10), %v2216_v51, 0.0 }
 0x222   : > { %v2651_v2 = vpack.c.bf16 (!%p2638_p10), %v2224_v62, %v2223_v59 }
 0x224   : > { %2261 = vst [vmem:[#allocation9 + $0x10] sm:$0xff] (!%p2638_p10), %v2651_v2 }
 0x24e   : > { %v2093_v7 = vpop.f32.mrb[12].mxu0 }
 0x24f   : > { %v2095_v10 = vpop.f32.mrb[13].mxu0 }
 0x250   : > { %v2134_v9 = vpop.f32.mrb[12].mxu1  ;;  %v2097_v14 = vpop.f32.mrb[14].mxu0  ;;  %2160 = sbr.rel (%p2638_p10) target bundleno = 613 (0x265), region = 52 }
 0x251   : > { %v2135_v11 = vadd.f32 %v2134_v9, %v2093_v7  ;;  %v2136_v13 = vpop.f32.mrb[13].mxu1  ;;  %v2098_v18 = vpop.f32.mrb[15].mxu0 }
 0x252   : > { %v2137_v15 = vadd.f32 %v2136_v13, %v2095_v10  ;;  %v2138_v16 = vpop.f32.mrb[14].mxu1 }
 0x253   : > { %v2147_v19 = vadd.f32 %v2135_v11, %v255_v8  ;;  %v2139_v21 = vpop.f32.mrb[15].mxu1 }
 0x254   : > { %v2148_v22 = vadd.f32 %v2137_v15, %v256_v12 }
 0x255   : > { %2155 = vst [vmem:[#allocation2 + $0x30] sm:$0xff] %v2147_v19 }
 0x256   : > { %2156 = vst [vmem:[#allocation2 + $0x38] sm:$0xff] %v2148_v22 }
 0x25c   : > { %v2167_v42 = vld [vmem:[#allocation2 + $0x30] sm:$0xff] }
 0x25d   : > { %v2168_v43 = vld [vmem:[#allocation2 + $0x38] sm:$0xff]  ;;  %v2217_v52 = vadd.f32 %v2198_v20, %v2167_v42 }
 0x25e   : > { %v2218_v53 = vadd.f32 %v2202_v45, %v2168_v43 }
 0x25f   : > { %v2225_v60 = vmax.f32 %v2217_v52, 0.0 }
 0x260   : > { %v2226_v63 = vmax.f32 %v2218_v53, 0.0 }
 0x262   : > { %v2652_v3 = vpack.c.bf16 %v2226_v63, %v2225_v60 }
 0x264   : > { %2262 = vst [vmem:[#allocation9 + $0x18] sm:$0xff] %v2652_v3 }
 0x265 PF: > { %p2683_p0 = scmp.eq.s32.totalorder %s2975_s18, 4  ;;  %s2925_s15 = smov [#allocation9]  }
 0x266   : > { %s2273_s26 = sshll.u32 %s2925_s15, 4  ;;  %s2274_s26 = int_to_ptr.vmem [resolvable:$true] %s2273_s26 }
 0x267   : > { %s2829_s29 = scalar_lea.vmem %s2274_s26, 512  ;;  %p2836_p1 = scmp.lt.s32.totalorder %s2274_s26, %s2274_s26 }
 0x268   : > { %p2830_p11 = scmp.ne.s32.totalorder %s2274_s26, %s2829_s29  ;;  %p2837_p2 = scmp.lt.s32.totalorder %s2829_s29, %s2829_s29 }
 0x26a   : > { %p2831_p13 = pnand %p2830_p11, %p2683_p0  ;;  %p2838_p6 = por %p2837_p2, %p2836_p1 }
 0x26c   : > { %p2832_p8 = pneg %p2831_p13 }
 0x26e   : > { %p2839_p12 = pnand %p2838_p6, %p2832_p8 }
 0x270   : > { %2842 = shalt.err (!%p2839_p12)
}
 0x271   : > { %s2843_s19 = scalar_lea.hbm %s3458_s3, 512 }
 0x272   : > { %p2844_p4 = scmp.ne.s32.totalorder %s3458_s3, %s2843_s19  ;;  %p2849_p7 = scmp.lt.u32.totalorder %s2843_s19, %s3458_s3 }
 0x274   : > { %p2845_p5 = pnand %p2844_p4, %p2683_p0 }
 0x276   : > { %p2846_p3 = pneg %p2845_p5 }
 0x278   : > { %p2851_p9 = pnand %p2849_p7, %p2846_p3 }
 0x27a   : > { %2854 = shalt.err (!%p2851_p9)
}
 0x27b   : > { %2664 = dma.vmem_to_hbm [thread:$0]  (%p2683_p0), %s2274_s26, 512, %s3458_s3, [#allocation5]  }
 0x27c   : > { %2892 = dma.done.wait (%p2683_p0), [#allocation5], 512  }
 0x27d   : > { %2894 = vsyncadd (%p2683_p0), [#allocation5], 4294966784 }
 0x27e PF: > { %s18_s17 = sadd.s32 1, %s2917_s17   ;;  %s3474_s12 = smov %s2901_s13 }
 0x27f   : > { %p15_p10 = scmp.ge.s32.totalorder %s18_s17, 7   ;;  %s3475_s13 = smov %s2905_s14 }
 0x280   : > { %s3476_s14 = smov %s3068_s28  ;;  %s3477_s15 = smov %s2913_s16 }
 0x281   : > { %s3478_s16 = smov %s3480_s7  ;;  %17 = sbr.rel (!%p15_p10) target bundleno = 6 (0x6), region = 89 }
 0x288   :  { %2286 = vsyncpa [#allocation4], 1 }
 0x289   :  { %2288 = vsyncpa [#allocation4 + $0x1], 1 }
 0x28a   :  { %2289 = vsyncpa [#allocation7], 1 }
 0x28b   :  { %2291 = vsyncpa [#allocation7 + $0x1], 1 }
 0x28c   :  { %2292 = vsyncpa [#allocation5], 1 }
 0x28d   :  { %2294 = vsyncpa [#allocation5 + $0x1], 1 }

</bundles_post_ra>
